<compile_context>
chip_gen: v7x
topology: tpu7x:2x2x1
jax: 0.10.0
libtpu: 0.0.40
codegen_flags: <defaults>
</compile_context>

<pallas_src>
import jax
import jax.numpy as jnp
from jax.experimental import pallas as pl
from jax.experimental.pallas import tpu as pltpu

MAX_LANE_TILE = 1024   # upper bound on lane-dim tile (multiple of 256)
MIN_LANE_TILE = 256


# ----------------------------- Pallas kernels ------------------------------

def _conv_relu_pool_kernel(w_ref, b_ref, p_ref, o_ref):
    """Fused conv (matmul over 4 pool-corner patch slabs) + bias + ReLU + pool.

    w: (Cout, K) bf16; b: (Cout, 1) f32; p: (4, K, T) bf16; o: (Cout, T) bf16.
    pool(relu(conv + b)) == relu(max_corners(conv) + b) since the bias is
    corner-invariant and ReLU is monotone.
    """
    w = w_ref[...]
    acc = jnp.dot(w, p_ref[0], preferred_element_type=jnp.float32)
    acc = jnp.maximum(acc, jnp.dot(w, p_ref[1], preferred_element_type=jnp.float32))
    acc = jnp.maximum(acc, jnp.dot(w, p_ref[2], preferred_element_type=jnp.float32))
    acc = jnp.maximum(acc, jnp.dot(w, p_ref[3], preferred_element_type=jnp.float32))
    o_ref[...] = jnp.maximum(acc + b_ref[...], 0.0).astype(o_ref.dtype)


def _mlp_kernel(x_ref, w1_ref, b1_ref, w2_ref, b2_ref, w3_ref, b3_ref, o_ref):
    """Fused fc1+ReLU -> fc2+ReLU -> fc3; intermediates stay in VMEM.

    x: (400, T) bf16 (features x batch-lanes), w_i: (out, in) bf16,
    b_i: (out, 1) f32, o: (16, T) f32 (rows >= 10 are zero padding).
    """
    h = jnp.dot(w1_ref[...], x_ref[...], preferred_element_type=jnp.float32)
    h = jnp.maximum(h + b1_ref[...], 0.0)
    h = jnp.dot(w2_ref[...], h.astype(w2_ref.dtype), preferred_element_type=jnp.float32)
    h = jnp.maximum(h + b2_ref[...], 0.0)
    h = jnp.dot(w3_ref[...], h.astype(w3_ref.dtype), preferred_element_type=jnp.float32)
    o_ref[...] = (h + b3_ref[...]).astype(o_ref.dtype)


# ----------------------------- helpers --------------------------------------

def _round_up(n, m):
    return -(-n // m) * m


def _lane_tile(m):
    """Biggest lane tile <= MAX_LANE_TILE, but keep >= 2 grid steps when there
    is enough work so v7x can shard the grid axis across both TensorCores."""
    t = min(MAX_LANE_TILE, _round_up(m, MIN_LANE_TILE))
    if m > MIN_LANE_TILE and _round_up(m, t) // t < 2:
        t = max(MIN_LANE_TILE, t // 2)
    return t


def _corner_patches(a, k):
    """All four pool-corner im2col patch matrices in one array.

    a: (C, N, H, W) channel-major. Returns (4, C*k*k, N*Hp*Wp) bf16 with
    feature order (c, kh, kw) (PyTorch Conv2d weight flattening); lane index
    m = n*Hp*Wp + hp*Wp + wp is the pooled output position; corner dy*2+dx
    selects conv-output position (2*hp+dy, 2*wp+dx).
    """
    C, N, H, W = a.shape
    hp, wp = (H - k + 1) // 2, (W - k + 1) // 2
    slabs = [a[:, :, dy + kh:dy + kh + 2 * hp:2, dx + kw:dx + kw + 2 * wp:2]
             for dy in (0, 1) for dx in (0, 1)
             for kh in range(k) for kw in range(k)]
    p = jnp.stack(slabs, axis=1)                       # (C, 4*k*k, N, Hp, Wp)
    p = p.reshape(C, 4, k * k, N * hp * wp)
    p = jnp.transpose(p, (1, 0, 2, 3))                 # (4, C, k*k, M)
    return p.reshape(4, C * k * k, N * hp * wp).astype(jnp.bfloat16)


# ----------------------------- wrappers --------------------------------------

def conv_relu_pool(a, w, b, k):
    """pool(relu(conv2d + b)), stride-1 valid conv, 2x2 stride-2 max-pool.

    a: (C, N, H, W) channel-major bf16, w: (Cout_p, K_p) bf16, b: (Cout_p,1) f32.
    Returns (Cout_p, N, Hp, Wp) bf16 channel-major (padded output channels are
    exactly zero because the padded weight/bias rows are zero).
    """
    C, N, H, W = a.shape
    cout_p, k_p = w.shape
    hp, wp = (H - k + 1) // 2, (W - k + 1) // 2
    m = N * hp * wp
    t = _lane_tile(m)
    m_pad = _round_up(m, t)

    p = _corner_patches(a, k)                                       # (4, C*k*k, m)
    p = jnp.pad(p, ((0, 0), (0, k_p - C * k * k), (0, m_pad - m)))  # (4, K_p, m_pad)

    out = pl.pallas_call(
        _conv_relu_pool_kernel,
        out_shape=jax.ShapeDtypeStruct((cout_p, m_pad), jnp.bfloat16),
        grid=(m_pad // t,),
        in_specs=[
            pl.BlockSpec((cout_p, k_p), lambda i: (0, 0)),
            pl.BlockSpec((cout_p, 1), lambda i: (0, 0)),
            pl.BlockSpec((4, k_p, t), lambda i: (0, 0, i)),
        ],
        out_specs=pl.BlockSpec((cout_p, t), lambda i: (0, i)),
        compiler_params=pltpu.CompilerParams(dimension_semantics=("parallel",)),
    )(w, b, p)

    return out[:, :m].reshape(cout_p, N, hp, wp)


def mlp_head(xt, w1, b1, w2, b2, w3, b3):
    """Fused fc1/fc2/fc3. xt: (400, N) feature-major; returns (N, 10) f32."""
    feat, n = xt.shape
    t = _lane_tile(n)
    n_pad = _round_up(n, t)
    x = jnp.pad(xt.astype(jnp.bfloat16), ((0, 0), (0, n_pad - n)))

    def full(arr):
        return pl.BlockSpec(arr.shape, lambda i: (0, 0))

    out = pl.pallas_call(
        _mlp_kernel,
        out_shape=jax.ShapeDtypeStruct((w3.shape[0], n_pad), jnp.float32),
        grid=(n_pad // t,),
        in_specs=[
            pl.BlockSpec((feat, t), lambda i: (0, i)),
            full(w1), full(b1), full(w2), full(b2), full(w3), full(b3),
        ],
        out_specs=pl.BlockSpec((w3.shape[0], t), lambda i: (0, i)),
        compiler_params=pltpu.CompilerParams(dimension_semantics=("parallel",)),
    )(x, w1, b1, w2, b2, w3, b3)
    return out[:10, :n].T                               # (N, 10) f32


# ----------------------------- parameters -----------------------------------

def init_params(key):
    ks = jax.random.split(key, 10)

    def u(k_, shape, fan):
        bound = 1.0 / jnp.sqrt(float(fan))
        return jax.random.uniform(k_, shape, jnp.float32, -bound, bound)

    p = {}
    # conv1: Conv2d(3, 6, 5) -> (Cout 6->8, K 75->80) zero-padded, bf16.
    w1 = u(ks[0], (6, 3, 5, 5), 75).reshape(6, 75)
    p["conv1_w"] = jnp.pad(w1, ((0, 2), (0, 5))).astype(jnp.bfloat16)        # (8, 80)
    p["conv1_b"] = jnp.pad(u(ks[1], (6,), 75), (0, 2)).reshape(8, 1)
    # conv2: Conv2d(6, 16, 5) -> in-channels padded 6->8 (zero cols), K = 200.
    w2 = jnp.pad(u(ks[2], (16, 6, 5, 5), 150), ((0, 0), (0, 2), (0, 0), (0, 0)))
    p["conv2_w"] = w2.reshape(16, 200).astype(jnp.bfloat16)                  # (16, 200)
    p["conv2_b"] = u(ks[3], (16,), 150).reshape(16, 1)
    # fc layers stored (out, in) — exactly the layout the fused kernel consumes.
    p["fc1_w"] = u(ks[4], (120, 400), 400).astype(jnp.bfloat16)
    p["fc1_b"] = u(ks[5], (120,), 400).reshape(120, 1)
    w_fc2 = u(ks[6], (84, 120), 120)                                          # out 84->96
    p["fc2_w"] = jnp.pad(w_fc2, ((0, 12), (0, 0))).astype(jnp.bfloat16)      # (96, 120)
    p["fc2_b"] = jnp.pad(u(ks[7], (84,), 120), (0, 12)).reshape(96, 1)
    w_fc3 = u(ks[8], (10, 84), 84)                                            # out 10->16
    p["fc3_w"] = jnp.pad(w_fc3, ((0, 6), (0, 12))).astype(jnp.bfloat16)      # (16, 96)
    p["fc3_b"] = jnp.pad(u(ks[9], (10,), 84), (0, 6)).reshape(16, 1)
    return p


# ----------------------------- forward ---------------------------------------

def net_forward(params, x):
    # x: (N, 3, 32, 32) NCHW float32 (CIFAR-sized, as fc1's 16*5*5 input implies)
    a = jnp.transpose(x.astype(jnp.bfloat16), (1, 0, 2, 3))          # (3, N, 32, 32)
    a = conv_relu_pool(a, params["conv1_w"], params["conv1_b"], 5)   # (8, N, 14, 14)
    a = conv_relu_pool(a, params["conv2_w"], params["conv2_b"], 5)   # (16, N, 5, 5)
    n = a.shape[1]
    # torch.flatten(x, 1) ordering (c, h, w); keep batch on the lane dim.
    xt = jnp.transpose(a, (0, 2, 3, 1)).reshape(16 * 5 * 5, n)       # (400, N)
    return mlp_head(xt, params["fc1_w"], params["fc1_b"],
                    params["fc2_w"], params["fc2_b"],
                    params["fc3_w"], params["fc3_b"])                # (N, 10) f32


if __name__ == "__main__":
    key = jax.random.PRNGKey(0)
    pkey, xkey = jax.random.split(key)
    params = init_params(pkey)
    x = jax.random.normal(xkey, (2, 3, 32, 32), dtype=jnp.float32)
    out = jax.jit(net_forward)(params, x)
    out = jax.block_until_ready(out)
    assert out.shape == (2, 10), out.shape
    assert out.dtype == jnp.float32
    assert bool(jnp.all(jnp.isfinite(out)))
    print("KERNEL_OK")
</pallas_src>

<mosaic_0001>
module attributes {stable_mosaic.version = 11 : i64} {
  func.func @_conv_relu_pool_kernel(%arg0: i32, %arg1: memref<8x80xbf16, #tpu.memory_space<vmem>>, %arg2: memref<8x1xf32, #tpu.memory_space<vmem>>, %arg3: memref<4x80x256xbf16, #tpu.memory_space<vmem>>, %arg4: memref<8x256xbf16, #tpu.memory_space<vmem>>) attributes {dimension_semantics = [#tpu.dimension_semantics<parallel>], iteration_bounds = array<i64: 2>, scalar_prefetch = 0 : i64, scratch_operands = 0 : i64, tpu.core_type = #tpu.core_type<tc>, window_params = [{pipeline_mode = #tpu.pipeline_mode<synchronous>, transform_indices = @transform_0, window_bounds = array<i64: 8, 80>}, {pipeline_mode = #tpu.pipeline_mode<synchronous>, transform_indices = @transform_1, window_bounds = array<i64: 8, 1>}, {transform_indices = @transform_2, window_bounds = array<i64: 4, 80, 256>}, {transform_indices = @transform_3, window_bounds = array<i64: 8, 256>}]} {
    %c0 = arith.constant 0 : index
    %c0_0 = arith.constant 0 : index
    %0 = vector.load %arg1[%c0, %c0_0] : memref<8x80xbf16, #tpu.memory_space<vmem>>, vector<8x80xbf16>
    %c0_1 = arith.constant 0 : index
    %c0_2 = arith.constant 0 : index
    %c0_3 = arith.constant 0 : index
    %1 = vector.load %arg3[%c0_1, %c0_2, %c0_3] : memref<4x80x256xbf16, #tpu.memory_space<vmem>>, vector<1x80x256xbf16>
    %2 = vector.shape_cast %1 : vector<1x80x256xbf16> to vector<80x256xbf16>
    %cst = arith.constant dense<0.000000e+00> : vector<8x256xf32>
    %3 = tpu.matmul %0, %2, %cst {dimension_numbers = #tpu.dot_dimension_numbers<[1], [0], [0], [1], [0, 0, 1, 1], [], []>} : vector<8x80xbf16>, vector<80x256xbf16>, vector<8x256xf32> -> vector<8x256xf32>
    %c1 = arith.constant 1 : index
    %c0_4 = arith.constant 0 : index
    %c0_5 = arith.constant 0 : index
    %4 = vector.load %arg3[%c1, %c0_4, %c0_5] : memref<4x80x256xbf16, #tpu.memory_space<vmem>>, vector<1x80x256xbf16>
    %5 = vector.shape_cast %4 : vector<1x80x256xbf16> to vector<80x256xbf16>
    %cst_6 = arith.constant dense<0.000000e+00> : vector<8x256xf32>
    %6 = tpu.matmul %0, %5, %cst_6 {dimension_numbers = #tpu.dot_dimension_numbers<[1], [0], [0], [1], [0, 0, 1, 1], [], []>} : vector<8x80xbf16>, vector<80x256xbf16>, vector<8x256xf32> -> vector<8x256xf32>
    %7 = arith.maximumf %3, %6 : vector<8x256xf32>
    %c2 = arith.constant 2 : index
    %c0_7 = arith.constant 0 : index
    %c0_8 = arith.constant 0 : index
    %8 = vector.load %arg3[%c2, %c0_7, %c0_8] : memref<4x80x256xbf16, #tpu.memory_space<vmem>>, vector<1x80x256xbf16>
    %9 = vector.shape_cast %8 : vector<1x80x256xbf16> to vector<80x256xbf16>
    %cst_9 = arith.constant dense<0.000000e+00> : vector<8x256xf32>
    %10 = tpu.matmul %0, %9, %cst_9 {dimension_numbers = #tpu.dot_dimension_numbers<[1], [0], [0], [1], [0, 0, 1, 1], [], []>} : vector<8x80xbf16>, vector<80x256xbf16>, vector<8x256xf32> -> vector<8x256xf32>
    %11 = arith.maximumf %7, %10 : vector<8x256xf32>
    %c3 = arith.constant 3 : index
    %c0_10 = arith.constant 0 : index
    %c0_11 = arith.constant 0 : index
    %12 = vector.load %arg3[%c3, %c0_10, %c0_11] : memref<4x80x256xbf16, #tpu.memory_space<vmem>>, vector<1x80x256xbf16>
    %13 = vector.shape_cast %12 : vector<1x80x256xbf16> to vector<80x256xbf16>
    %cst_12 = arith.constant dense<0.000000e+00> : vector<8x256xf32>
    %14 = tpu.matmul %0, %13, %cst_12 {dimension_numbers = #tpu.dot_dimension_numbers<[1], [0], [0], [1], [0, 0, 1, 1], [], []>} : vector<8x80xbf16>, vector<80x256xbf16>, vector<8x256xf32> -> vector<8x256xf32>
    %15 = arith.maximumf %11, %14 : vector<8x256xf32>
    %c0_13 = arith.constant 0 : index
    %c0_14 = arith.constant 0 : index
    %16 = vector.load %arg2[%c0_13, %c0_14] : memref<8x1xf32, #tpu.memory_space<vmem>>, vector<8x1xf32>
    %17 = vector.broadcast %16 : vector<8x1xf32> to vector<8x256xf32>
    %18 = arith.addf %15, %17 : vector<8x256xf32>
    %cst_15 = arith.constant 0.000000e+00 : f32
    %19 = vector.broadcast %cst_15 : f32 to vector<8x256xf32>
    %20 = arith.maximumf %18, %19 : vector<8x256xf32>
    %21 = arith.truncf %20 : vector<8x256xf32> to vector<8x256xbf16>
    %c0_16 = arith.constant 0 : index
    %c0_17 = arith.constant 0 : index
    %22 = vector.load %arg4[%c0_16, %c0_17] : memref<8x256xbf16, #tpu.memory_space<vmem>>, vector<8x256xbf16>
    tpu.vector_store %arg4[%c0_16, %c0_17], %21 {strides = array<i32>} : memref<8x256xbf16, #tpu.memory_space<vmem>>, vector<8x256xbf16>,
    return
  }
  func.func @transform_0(%arg0: i32) -> (i32, i32) {
    %c0_i32 = arith.constant 0 : i32
    %c0_i32_0 = arith.constant 0 : i32
    %c0_i32_1 = arith.constant 0 : i32
    return %c0_i32, %c0_i32_0 : i32, i32
  }
  func.func @transform_1(%arg0: i32) -> (i32, i32) {
    %c0_i32 = arith.constant 0 : i32
    %c0_i32_0 = arith.constant 0 : i32
    %c0_i32_1 = arith.constant 0 : i32
    return %c0_i32, %c0_i32_0 : i32, i32
  }
  func.func @transform_2(%arg0: i32) -> (i32, i32, i32) {
    %c0_i32 = arith.constant 0 : i32
    %c0_i32_0 = arith.constant 0 : i32
    %c0_i32_1 = arith.constant 0 : i32
    return %c0_i32, %c0_i32_0, %arg0 : i32, i32, i32
  }
  func.func @transform_3(%arg0: i32) -> (i32, i32) {
    %c0_i32 = arith.constant 0 : i32
    %c0_i32_0 = arith.constant 0 : i32
    return %c0_i32, %arg0 : i32, i32
  }
}

module attributes {stable_mosaic.version = 11 : i64} {
  func.func @_conv_relu_pool_kernel(%arg0: i32, %arg1: memref<16x200xbf16, #tpu.memory_space<vmem>>, %arg2: memref<16x1xf32, #tpu.memory_space<vmem>>, %arg3: memref<4x200x256xbf16, #tpu.memory_space<vmem>>, %arg4: memref<16x256xbf16, #tpu.memory_space<vmem>>) attributes {dimension_semantics = [#tpu.dimension_semantics<parallel>], iteration_bounds = array<i64: 1>, scalar_prefetch = 0 : i64, scratch_operands = 0 : i64, tpu.core_type = #tpu.core_type<tc>, window_params = [{pipeline_mode = #tpu.pipeline_mode<synchronous>, transform_indices = @transform_0, window_bounds = array<i64: 16, 200>}, {pipeline_mode = #tpu.pipeline_mode<synchronous>, transform_indices = @transform_1, window_bounds = array<i64: 16, 1>}, {transform_indices = @transform_2, window_bounds = array<i64: 4, 200, 256>}, {transform_indices = @transform_3, window_bounds = array<i64: 16, 256>}]} {
    %c0 = arith.constant 0 : index
    %c0_0 = arith.constant 0 : index
    %0 = vector.load %arg1[%c0, %c0_0] : memref<16x200xbf16, #tpu.memory_space<vmem>>, vector<16x200xbf16>
    %c0_1 = arith.constant 0 : index
    %c0_2 = arith.constant 0 : index
    %c0_3 = arith.constant 0 : index
    %1 = vector.load %arg3[%c0_1, %c0_2, %c0_3] : memref<4x200x256xbf16, #tpu.memory_space<vmem>>, vector<1x200x256xbf16>
    %2 = vector.shape_cast %1 : vector<1x200x256xbf16> to vector<200x256xbf16>
    %cst = arith.constant dense<0.000000e+00> : vector<16x256xf32>
    %3 = tpu.matmul %0, %2, %cst {dimension_numbers = #tpu.dot_dimension_numbers<[1], [0], [0], [1], [0, 0, 1, 1], [], []>} : vector<16x200xbf16>, vector<200x256xbf16>, vector<16x256xf32> -> vector<16x256xf32>
    %c1 = arith.constant 1 : index
    %c0_4 = arith.constant 0 : index
    %c0_5 = arith.constant 0 : index
    %4 = vector.load %arg3[%c1, %c0_4, %c0_5] : memref<4x200x256xbf16, #tpu.memory_space<vmem>>, vector<1x200x256xbf16>
    %5 = vector.shape_cast %4 : vector<1x200x256xbf16> to vector<200x256xbf16>
    %cst_6 = arith.constant dense<0.000000e+00> : vector<16x256xf32>
    %6 = tpu.matmul %0, %5, %cst_6 {dimension_numbers = #tpu.dot_dimension_numbers<[1], [0], [0], [1], [0, 0, 1, 1], [], []>} : vector<16x200xbf16>, vector<200x256xbf16>, vector<16x256xf32> -> vector<16x256xf32>
    %7 = arith.maximumf %3, %6 : vector<16x256xf32>
    %c2 = arith.constant 2 : index
    %c0_7 = arith.constant 0 : index
    %c0_8 = arith.constant 0 : index
    %8 = vector.load %arg3[%c2, %c0_7, %c0_8] : memref<4x200x256xbf16, #tpu.memory_space<vmem>>, vector<1x200x256xbf16>
    %9 = vector.shape_cast %8 : vector<1x200x256xbf16> to vector<200x256xbf16>
    %cst_9 = arith.constant dense<0.000000e+00> : vector<16x256xf32>
    %10 = tpu.matmul %0, %9, %cst_9 {dimension_numbers = #tpu.dot_dimension_numbers<[1], [0], [0], [1], [0, 0, 1, 1], [], []>} : vector<16x200xbf16>, vector<200x256xbf16>, vector<16x256xf32> -> vector<16x256xf32>
    %11 = arith.maximumf %7, %10 : vector<16x256xf32>
    %c3 = arith.constant 3 : index
    %c0_10 = arith.constant 0 : index
    %c0_11 = arith.constant 0 : index
    %12 = vector.load %arg3[%c3, %c0_10, %c0_11] : memref<4x200x256xbf16, #tpu.memory_space<vmem>>, vector<1x200x256xbf16>
    %13 = vector.shape_cast %12 : vector<1x200x256xbf16> to vector<200x256xbf16>
    %cst_12 = arith.constant dense<0.000000e+00> : vector<16x256xf32>
    %14 = tpu.matmul %0, %13, %cst_12 {dimension_numbers = #tpu.dot_dimension_numbers<[1], [0], [0], [1], [0, 0, 1, 1], [], []>} : vector<16x200xbf16>, vector<200x256xbf16>, vector<16x256xf32> -> vector<16x256xf32>
    %15 = arith.maximumf %11, %14 : vector<16x256xf32>
    %c0_13 = arith.constant 0 : index
    %c0_14 = arith.constant 0 : index
    %16 = vector.load %arg2[%c0_13, %c0_14] : memref<16x1xf32, #tpu.memory_space<vmem>>, vector<16x1xf32>
    %17 = vector.broadcast %16 : vector<16x1xf32> to vector<16x256xf32>
    %18 = arith.addf %15, %17 : vector<16x256xf32>
    %cst_15 = arith.constant 0.000000e+00 : f32
    %19 = vector.broadcast %cst_15 : f32 to vector<16x256xf32>
    %20 = arith.maximumf %18, %19 : vector<16x256xf32>
    %21 = arith.truncf %20 : vector<16x256xf32> to vector<16x256xbf16>
    %c0_16 = arith.constant 0 : index
    %c0_17 = arith.constant 0 : index
    %22 = vector.load %arg4[%c0_16, %c0_17] : memref<16x256xbf16, #tpu.memory_space<vmem>>, vector<16x256xbf16>
    tpu.vector_store %arg4[%c0_16, %c0_17], %21 {strides = array<i32>} : memref<16x256xbf16, #tpu.memory_space<vmem>>, vector<16x256xbf16>,
    return
  }
  func.func @transform_0(%arg0: i32) -> (i32, i32) {
    %c0_i32 = arith.constant 0 : i32
    %c0_i32_0 = arith.constant 0 : i32
    %c0_i32_1 = arith.constant 0 : i32
    return %c0_i32, %c0_i32_0 : i32, i32
  }
  func.func @transform_1(%arg0: i32) -> (i32, i32) {
    %c0_i32 = arith.constant 0 : i32
    %c0_i32_0 = arith.constant 0 : i32
    %c0_i32_1 = arith.constant 0 : i32
    return %c0_i32, %c0_i32_0 : i32, i32
  }
  func.func @transform_2(%arg0: i32) -> (i32, i32, i32) {
    %c0_i32 = arith.constant 0 : i32
    %c0_i32_0 = arith.constant 0 : i32
    %c0_i32_1 = arith.constant 0 : i32
    return %c0_i32, %c0_i32_0, %arg0 : i32, i32, i32
  }
  func.func @transform_3(%arg0: i32) -> (i32, i32) {
    %c0_i32 = arith.constant 0 : i32
    %c0_i32_0 = arith.constant 0 : i32
    return %c0_i32, %arg0 : i32, i32
  }
}

module attributes {stable_mosaic.version = 11 : i64} {
  func.func @_mlp_kernel(%arg0: i32, %arg1: memref<400x256xbf16, #tpu.memory_space<vmem>>, %arg2: memref<120x400xbf16, #tpu.memory_space<vmem>>, %arg3: memref<120x1xf32, #tpu.memory_space<vmem>>, %arg4: memref<96x120xbf16, #tpu.memory_space<vmem>>, %arg5: memref<96x1xf32, #tpu.memory_space<vmem>>, %arg6: memref<16x96xbf16, #tpu.memory_space<vmem>>, %arg7: memref<16x1xf32, #tpu.memory_space<vmem>>, %arg8: memref<16x256xf32, #tpu.memory_space<vmem>>) attributes {dimension_semantics = [#tpu.dimension_semantics<parallel>], iteration_bounds = array<i64: 1>, scalar_prefetch = 0 : i64, scratch_operands = 0 : i64, tpu.core_type = #tpu.core_type<tc>, window_params = [{transform_indices = @transform_0, window_bounds = array<i64: 400, 256>}, {pipeline_mode = #tpu.pipeline_mode<synchronous>, transform_indices = @transform_1, window_bounds = array<i64: 120, 400>}, {pipeline_mode = #tpu.pipeline_mode<synchronous>, transform_indices = @transform_2, window_bounds = array<i64: 120, 1>}, {pipeline_mode = #tpu.pipeline_mode<synchronous>, transform_indices = @transform_3, window_bounds = array<i64: 96, 120>}, {pipeline_mode = #tpu.pipeline_mode<synchronous>, transform_indices = @transform_4, window_bounds = array<i64: 96, 1>}, {pipeline_mode = #tpu.pipeline_mode<synchronous>, transform_indices = @transform_5, window_bounds = array<i64: 16, 96>}, {pipeline_mode = #tpu.pipeline_mode<synchronous>, transform_indices = @transform_6, window_bounds = array<i64: 16, 1>}, {transform_indices = @transform_7, window_bounds = array<i64: 16, 256>}]} {
    %c0 = arith.constant 0 : index
    %c0_0 = arith.constant 0 : index
    %0 = vector.load %arg2[%c0, %c0_0] : memref<120x400xbf16, #tpu.memory_space<vmem>>, vector<120x400xbf16>
    %c0_1 = arith.constant 0 : index
    %c0_2 = arith.constant 0 : index
    %1 = vector.load %arg1[%c0_1, %c0_2] : memref<400x256xbf16, #tpu.memory_space<vmem>>, vector<400x256xbf16>
    %cst = arith.constant dense<0.000000e+00> : vector<120x256xf32>
    %2 = tpu.matmul %0, %1, %cst {dimension_numbers = #tpu.dot_dimension_numbers<[1], [0], [0], [1], [0, 0, 1, 1], [], []>} : vector<120x400xbf16>, vector<400x256xbf16>, vector<120x256xf32> -> vector<120x256xf32>
    %c0_3 = arith.constant 0 : index
    %c0_4 = arith.constant 0 : index
    %3 = vector.load %arg3[%c0_3, %c0_4] : memref<120x1xf32, #tpu.memory_space<vmem>>, vector<120x1xf32>
    %4 = vector.broadcast %3 : vector<120x1xf32> to vector<120x256xf32>
    %5 = arith.addf %2, %4 : vector<120x256xf32>
    %cst_5 = arith.constant 0.000000e+00 : f32
    %6 = vector.broadcast %cst_5 : f32 to vector<120x256xf32>
    %7 = arith.maximumf %5, %6 : vector<120x256xf32>
    %c0_6 = arith.constant 0 : index
    %c0_7 = arith.constant 0 : index
    %8 = vector.load %arg4[%c0_6, %c0_7] : memref<96x120xbf16, #tpu.memory_space<vmem>>, vector<96x120xbf16>
    %9 = arith.truncf %7 : vector<120x256xf32> to vector<120x256xbf16>
    %cst_8 = arith.constant dense<0.000000e+00> : vector<96x256xf32>
    %10 = tpu.matmul %8, %9, %cst_8 {dimension_numbers = #tpu.dot_dimension_numbers<[1], [0], [0], [1], [0, 0, 1, 1], [], []>} : vector<96x120xbf16>, vector<120x256xbf16>, vector<96x256xf32> -> vector<96x256xf32>
    %c0_9 = arith.constant 0 : index
    %c0_10 = arith.constant 0 : index
    %11 = vector.load %arg5[%c0_9, %c0_10] : memref<96x1xf32, #tpu.memory_space<vmem>>, vector<96x1xf32>
    %12 = vector.broadcast %11 : vector<96x1xf32> to vector<96x256xf32>
    %13 = arith.addf %10, %12 : vector<96x256xf32>
    %cst_11 = arith.constant 0.000000e+00 : f32
    %14 = vector.broadcast %cst_11 : f32 to vector<96x256xf32>
    %15 = arith.maximumf %13, %14 : vector<96x256xf32>
    %c0_12 = arith.constant 0 : index
    %c0_13 = arith.constant 0 : index
    %16 = vector.load %arg6[%c0_12, %c0_13] : memref<16x96xbf16, #tpu.memory_space<vmem>>, vector<16x96xbf16>
    %17 = arith.truncf %15 : vector<96x256xf32> to vector<96x256xbf16>
    %cst_14 = arith.constant dense<0.000000e+00> : vector<16x256xf32>
    %18 = tpu.matmul %16, %17, %cst_14 {dimension_numbers = #tpu.dot_dimension_numbers<[1], [0], [0], [1], [0, 0, 1, 1], [], []>} : vector<16x96xbf16>, vector<96x256xbf16>, vector<16x256xf32> -> vector<16x256xf32>
    %c0_15 = arith.constant 0 : index
    %c0_16 = arith.constant 0 : index
    %19 = vector.load %arg7[%c0_15, %c0_16] : memref<16x1xf32, #tpu.memory_space<vmem>>, vector<16x1xf32>
    %20 = vector.broadcast %19 : vector<16x1xf32> to vector<16x256xf32>
    %21 = arith.addf %18, %20 : vector<16x256xf32>
    %c0_17 = arith.constant 0 : index
    %c0_18 = arith.constant 0 : index
    %22 = vector.load %arg8[%c0_17, %c0_18] : memref<16x256xf32, #tpu.memory_space<vmem>>, vector<16x256xf32>
    tpu.vector_store %arg8[%c0_17, %c0_18], %21 {strides = array<i32>} : memref<16x256xf32, #tpu.memory_space<vmem>>, vector<16x256xf32>,
    return
  }
  func.func @transform_0(%arg0: i32) -> (i32, i32) {
    %c0_i32 = arith.constant 0 : i32
    %c0_i32_0 = arith.constant 0 : i32
    return %c0_i32, %arg0 : i32, i32
  }
  func.func @transform_1(%arg0: i32) -> (i32, i32) {
    %c0_i32 = arith.constant 0 : i32
    %c0_i32_0 = arith.constant 0 : i32
    %c0_i32_1 = arith.constant 0 : i32
    return %c0_i32, %c0_i32_0 : i32, i32
  }
  func.func @transform_2(%arg0: i32) -> (i32, i32) {
    %c0_i32 = arith.constant 0 : i32
    %c0_i32_0 = arith.constant 0 : i32
    %c0_i32_1 = arith.constant 0 : i32
    return %c0_i32, %c0_i32_0 : i32, i32
  }
  func.func @transform_3(%arg0: i32) -> (i32, i32) {
    %c0_i32 = arith.constant 0 : i32
    %c0_i32_0 = arith.constant 0 : i32
    %c0_i32_1 = arith.constant 0 : i32
    return %c0_i32, %c0_i32_0 : i32, i32
  }
  func.func @transform_4(%arg0: i32) -> (i32, i32) {
    %c0_i32 = arith.constant 0 : i32
    %c0_i32_0 = arith.constant 0 : i32
    %c0_i32_1 = arith.constant 0 : i32
    return %c0_i32, %c0_i32_0 : i32, i32
  }
  func.func @transform_5(%arg0: i32) -> (i32, i32) {
    %c0_i32 = arith.constant 0 : i32
    %c0_i32_0 = arith.constant 0 : i32
    %c0_i32_1 = arith.constant 0 : i32
    return %c0_i32, %c0_i32_0 : i32, i32
  }
  func.func @transform_6(%arg0: i32) -> (i32, i32) {
    %c0_i32 = arith.constant 0 : i32
    %c0_i32_0 = arith.constant 0 : i32
    %c0_i32_1 = arith.constant 0 : i32
    return %c0_i32, %c0_i32_0 : i32, i32
  }
  func.func @transform_7(%arg0: i32) -> (i32, i32) {
    %c0_i32 = arith.constant 0 : i32
    %c0_i32_0 = arith.constant 0 : i32
    return %c0_i32, %arg0 : i32, i32
  }
}

</mosaic_0001>

<bundles_post_ra>
// kernel: net_forward.3
= control target key start
LH: loop header
LB: loop body
LE: loop exit
PB: predicated region body
PF: predicated region fallthrough
CT: control target
= control target key end

     0   :  { %s1085_s12 = smov 0   ;;  %s1087_s13 = smov 0   ;;  %s1278_s0 = inlined_call_operand.vmem [shape: bf16[8,80], index: 0, kind: input, shape index: {}]   ;;  %s1279_s1 = inlined_call_operand.vmem [shape: f32[8,1], index: 1, kind: input, shape index: {}]   ;;  %s1280_s2 = inlined_call_operand.vmem [shape: bf16[4,80,512], index: 2, kind: input, shape index: {}]   ;;  %s1281_s3 = inlined_call_operand.vmem [shape: bf16[8,512], index: 3, kind: output, shape index: {}]  }
   0x1   :  { %s1089_s14 = smov 0  }
   0x2 LB: > { %s864_s15 = sadd.s32 4294967295, %s1062_s14   ;;  %s1102_s16 = sadd.s32 1, %s1062_s14   ;;  %s1062_s14 = sphi %s1089_s14, %s1284_s14   ;;  %s1058_s13 = sphi %s1087_s13, %s1283_s13   ;;  %s1054_s12 = sphi %s1085_s12, %s1282_s12  }
   0x3   : > { %s59_s17 = ssub.s32 %s1062_s14, %s1102_s16  ;;  %s62_s18 = sadd.s32 1, %s1058_s13 }
   0x4   : > { %p60_p0 = scmp.eq.s32.totalorder %s59_s17, 0  ;;  %p69_p1 = scmp.ne.s32.totalorder %s1058_s13, %s1054_s12 }
   0x5   : > { %p70_p2 = scmp.eq.s32.totalorder %s1062_s14, 0  ;;  %p867_p4 = scmp.ge.s32.totalorder %s1062_s14, 2 }
   0x6   : > { %s1111_s19 = scalar_select %p60_p0, %s1058_s13, %s62_s18  }
   0x7   : > { %p71_p3 = por %p70_p2, %p69_p1  ;;  %127 = sbr.rel (%p867_p4) target bundleno = 38 (0x26), region = 24 }
   0xe   : > { %130 = sbr.rel (!%p71_p3) target bundleno = 38 (0x26), region = 28  ;;  %s132_s20 = sand.u32 (%p71_p3), 1, %s1058_s13  }
   0xf   : > { %s950_s21 = sshll.u32 (%p71_p3), %s1062_s14, 3  ;;  %s952_s22 = smul.u32 (%p71_p3), 320, %s132_s20 }
  0x10   : > { %s1119_s25 = scalar_lea.vmem (%p71_p3), %s1280_s2, %s950_s21 }
  0x11   : > { %v243_v0 = vld [vmem:[%s1119_s25] sm:$0xff] (%p71_p3)  ;;  %v245_v1 = vld [vmem:[%s1119_s25 + $0x10] sm:$0xff] (%p71_p3)  ;;  %s1127_s26 = scalar_lea.vmem (%p71_p3), [#allocation2], %s952_s22 }
  0x12   : > { %v247_v2 = vld [vmem:[%s1119_s25 + $0x20] sm:$0xff] (%p71_p3)  ;;  %v249_v3 = vld [vmem:[%s1119_s25 + $0x30] sm:$0xff] (%p71_p3)  ;;  %244 = vst [vmem:[%s1127_s26] sm:$0xff] (%p71_p3), %v243_v0  ;;  %246 = vst [vmem:[%s1127_s26 + $0x8] sm:$0xff] (%p71_p3), %v245_v1 }
  0x13   : > { %v251_v4 = vld [vmem:[%s1119_s25 + $0x40] sm:$0xff] (%p71_p3)  ;;  %v253_v5 = vld [vmem:[%s1119_s25 + $0x50] sm:$0xff] (%p71_p3)  ;;  %248 = vst [vmem:[%s1127_s26 + $0x10] sm:$0xff] (%p71_p3), %v247_v2  ;;  %250 = vst [vmem:[%s1127_s26 + $0x18] sm:$0xff] (%p71_p3), %v249_v3 }
  0x14   : > { %252 = vst [vmem:[%s1127_s26 + $0x20] sm:$0xff] (%p71_p3), %v251_v4  ;;  %254 = vst [vmem:[%s1127_s26 + $0x28] sm:$0xff] (%p71_p3), %v253_v5  ;;  %v255_v6 = vld [vmem:[%s1119_s25 + $0x60] sm:$0xff] (%p71_p3)  ;;  %v257_v7 = vld [vmem:[%s1119_s25 + $0x70] sm:$0xff] (%p71_p3) }
  0x15   : > { %v259_v8 = vld [vmem:[%s1119_s25 + $0x80] sm:$0xff]  ;;  %256 = vst [vmem:[%s1127_s26 + $0x30] sm:$0xff] %v255_v6  ;;  %258 = vst [vmem:[%s1127_s26 + $0x38] sm:$0xff] %v257_v7  ;;  %v261_v9 = vld [vmem:[%s1119_s25 + $0x90] sm:$0xff] }
  0x16   : > { %260 = vst [vmem:[%s1127_s26 + $0x40] sm:$0xff] %v259_v8  ;;  %v263_v10 = vld [vmem:[%s1119_s25 + $0xa0] sm:$0xff]  ;;  %v265_v11 = vld [vmem:[%s1119_s25 + $0xb0] sm:$0xff]  ;;  %262 = vst [vmem:[%s1127_s26 + $0x48] sm:$0xff] %v261_v9 }
  0x17   : > { %264 = vst [vmem:[%s1127_s26 + $0x50] sm:$0xff] %v263_v10  ;;  %266 = vst [vmem:[%s1127_s26 + $0x58] sm:$0xff] %v265_v11  ;;  %v267_v12 = vld [vmem:[%s1119_s25 + $0xc0] sm:$0xff]  ;;  %v269_v13 = vld [vmem:[%s1119_s25 + $0xd0] sm:$0xff] }
  0x18   : > { %v271_v14 = vld [vmem:[%s1119_s25 + $0xe0] sm:$0xff]  ;;  %268 = vst [vmem:[%s1127_s26 + $0x60] sm:$0xff] %v267_v12  ;;  %270 = vst [vmem:[%s1127_s26 + $0x68] sm:$0xff] %v269_v13  ;;  %v273_v15 = vld [vmem:[%s1119_s25 + $0xf0] sm:$0xff] }
  0x19   : > { %272 = vst [vmem:[%s1127_s26 + $0x70] sm:$0xff] %v271_v14  ;;  %v275_v16 = vld [vmem:[%s1119_s25 + $0x100] sm:$0xff]  ;;  %v277_v17 = vld [vmem:[%s1119_s25 + $0x110] sm:$0xff]  ;;  %274 = vst [vmem:[%s1127_s26 + $0x78] sm:$0xff] %v273_v15 }
  0x1a   : > { %276 = vst [vmem:[%s1127_s26 + $0x80] sm:$0xff] %v275_v16  ;;  %278 = vst [vmem:[%s1127_s26 + $0x88] sm:$0xff] %v277_v17  ;;  %v279_v18 = vld [vmem:[%s1119_s25 + $0x120] sm:$0xff]  ;;  %v281_v19 = vld [vmem:[%s1119_s25 + $0x130] sm:$0xff] }
  0x1b   : > { %v283_v20 = vld [vmem:[%s1119_s25 + $0x140] sm:$0xff]  ;;  %280 = vst [vmem:[%s1127_s26 + $0x90] sm:$0xff] %v279_v18  ;;  %282 = vst [vmem:[%s1127_s26 + $0x98] sm:$0xff] %v281_v19  ;;  %v285_v21 = vld [vmem:[%s1119_s25 + $0x150] sm:$0xff] }
  0x1c   : > { %284 = vst [vmem:[%s1127_s26 + $0xa0] sm:$0xff] %v283_v20  ;;  %v287_v22 = vld [vmem:[%s1119_s25 + $0x160] sm:$0xff]  ;;  %v289_v23 = vld [vmem:[%s1119_s25 + $0x170] sm:$0xff]  ;;  %286 = vst [vmem:[%s1127_s26 + $0xa8] sm:$0xff] %v285_v21 }
  0x1d   : > { %288 = vst [vmem:[%s1127_s26 + $0xb0] sm:$0xff] %v287_v22  ;;  %290 = vst [vmem:[%s1127_s26 + $0xb8] sm:$0xff] %v289_v23  ;;  %v291_v24 = vld [vmem:[%s1119_s25 + $0x180] sm:$0xff]  ;;  %v293_v25 = vld [vmem:[%s1119_s25 + $0x190] sm:$0xff] }
  0x1e   : > { %v295_v26 = vld [vmem:[%s1119_s25 + $0x1a0] sm:$0xff]  ;;  %292 = vst [vmem:[%s1127_s26 + $0xc0] sm:$0xff] %v291_v24  ;;  %294 = vst [vmem:[%s1127_s26 + $0xc8] sm:$0xff] %v293_v25  ;;  %v297_v27 = vld [vmem:[%s1119_s25 + $0x1b0] sm:$0xff] }
  0x1f   : > { %296 = vst [vmem:[%s1127_s26 + $0xd0] sm:$0xff] %v295_v26  ;;  %v299_v28 = vld [vmem:[%s1119_s25 + $0x1c0] sm:$0xff]  ;;  %v301_v29 = vld [vmem:[%s1119_s25 + $0x1d0] sm:$0xff]  ;;  %298 = vst [vmem:[%s1127_s26 + $0xd8] sm:$0xff] %v297_v27 }
  0x20   : > { %300 = vst [vmem:[%s1127_s26 + $0xe0] sm:$0xff] %v299_v28  ;;  %302 = vst [vmem:[%s1127_s26 + $0xe8] sm:$0xff] %v301_v29  ;;  %v303_v30 = vld [vmem:[%s1119_s25 + $0x1e0] sm:$0xff]  ;;  %v305_v31 = vld [vmem:[%s1119_s25 + $0x1f0] sm:$0xff] }
  0x21   : > { %v307_v32 = vld [vmem:[%s1119_s25 + $0x200] sm:$0xff]  ;;  %304 = vst [vmem:[%s1127_s26 + $0xf0] sm:$0xff] %v303_v30  ;;  %306 = vst [vmem:[%s1127_s26 + $0xf8] sm:$0xff] %v305_v31  ;;  %v309_v33 = vld [vmem:[%s1119_s25 + $0x210] sm:$0xff] }
  0x22   : > { %308 = vst [vmem:[%s1127_s26 + $0x100] sm:$0xff] %v307_v32  ;;  %v311_v34 = vld [vmem:[%s1119_s25 + $0x220] sm:$0xff]  ;;  %v313_v35 = vld [vmem:[%s1119_s25 + $0x230] sm:$0xff]  ;;  %310 = vst [vmem:[%s1127_s26 + $0x108] sm:$0xff] %v309_v33 }
  0x23   : > { %312 = vst [vmem:[%s1127_s26 + $0x110] sm:$0xff] %v311_v34  ;;  %314 = vst [vmem:[%s1127_s26 + $0x118] sm:$0xff] %v313_v35  ;;  %v315_v36 = vld [vmem:[%s1119_s25 + $0x240] sm:$0xff]  ;;  %v317_v37 = vld [vmem:[%s1119_s25 + $0x250] sm:$0xff] }
  0x24   : > { %v319_v38 = vld [vmem:[%s1119_s25 + $0x260] sm:$0xff]  ;;  %316 = vst [vmem:[%s1127_s26 + $0x120] sm:$0xff] %v315_v36  ;;  %318 = vst [vmem:[%s1127_s26 + $0x128] sm:$0xff] %v317_v37  ;;  %v321_v39 = vld [vmem:[%s1119_s25 + $0x270] sm:$0xff] }
  0x25   : > { %320 = vst [vmem:[%s1127_s26 + $0x130] sm:$0xff] %v319_v38  ;;  %322 = vst [vmem:[%s1127_s26 + $0x138] sm:$0xff] %v321_v39 }
  0x26 PF: > { %p870_p5 = scmp.ge.s32.totalorder %s1062_s14, 1  ;;  %p327_p6 = scmp.lt.s32.totalorder %s1062_s14, 3 }
  0x28   : > { %p328_p7 = pnand %p870_p5, %p327_p6 }
  0x29   : > { %s334_s27 = sand.u32 (!%p328_p7), 1, %s1054_s12   ;;  %v783_v40 = vld [vmem:[%s1279_s1] sm:$0xff] (!%p328_p7)  ;;  %v1064_v41 = vmov (!%p328_p7), 0   ;;  %vm426_vm0 = vcmask (!%p328_p7), 654336   ;;  %s871_s7 = sshll.u32 (!%p328_p7), %s864_s15, 1 }
  0x2a   : > { %331 = sbr.rel (%p328_p7) target bundleno = 311 (0x137), region = 66  ;;  %462 = vmatprep.mubr.bf16.mxu0 (!%p328_p7), %v1064_v41  ;;  %564 = vmatprep.mubr.bf16.mxu1 (!%p328_p7), %v1064_v41  ;;  %v365_v0 = vld [vmem:[%s1278_s0] sm:$0xf] (!%p328_p7)  ;;  %p359_p8 = scmp.lt.s32.totalorder (!%p328_p7), %s871_s7, 3 }
  0x2b   : > { %s953_s30 = smul.u32 (!%p328_p7), 320, %s334_s27  ;;  %979 = vset.pattern.permute.xlu0 (!%p328_p7), %v1064_v41 }
  0x2c   : > { %786 = vperm.xlu0 (!%p328_p7), %979, %v783_v40  }
  0x2d   : > { %s1212_s4 = scalar_lea.vmem (!%p328_p7), [#allocation2], %s953_s30 }
  0x2e   : > { %v980_v42 = vld [vmem:[%s1212_s4 + $0x4] ss:$8 sps:$4 sm:$0xff] (!%p328_p7)   ;;  %v982_v43 = vld [vmem:[%s1212_s4 + $0x54] ss:$8 sps:$4 sm:$0xff] (!%p328_p7)   ;;  %v984_v44 = vld [vmem:[%s1212_s4] ss:$8 sps:$4 sm:$0xff] (!%p328_p7)  }
  0x2f   : > { %430 = vmatprep.subr.bf16.mxu0 (!%p328_p7), %v980_v42  ;;  %v985_v45 = vld [vmem:[%s1212_s4 + $0x50] ss:$8 sps:$4 sm:$0xff] (!%p328_p7)   ;;  %532 = vmatprep.subr.bf16.mxu1 (!%p328_p7), %v982_v43  ;;  %v986_v46 = vld [vmem:[%s1212_s4 + $0x14] ss:$8 sps:$4 sm:$0xff] (!%p328_p7)   ;;  %v988_v47 = vld [vmem:[%s1212_s4 + $0x64] ss:$8 sps:$4 sm:$0xff] (!%p328_p7)  }
  0x30   : > { %431 = vmatpush1.bf16.msra.mxu0 (!%p328_p7), %v984_v44  ;;  %533 = vmatpush1.bf16.msra.mxu1 (!%p328_p7), %v985_v45  ;;  %v990_v48 = vld [vmem:[%s1212_s4 + $0x10] ss:$8 sps:$4 sm:$0xff] (!%p328_p7)   ;;  %v991_v49 = vld [vmem:[%s1212_s4 + $0x60] ss:$8 sps:$4 sm:$0xff] (!%p328_p7)   ;;  %v992_v50 = vld [vmem:[%s1212_s4 + $0x24] ss:$8 sps:$4 sm:$0xff] (!%p328_p7)  }
  0x31   : > { %432 = vmatprep.subr.bf16.mxu0 %v986_v46  ;;  %534 = vmatprep.subr.bf16.mxu1 %v988_v47  ;;  %v994_v51 = vld [vmem:[%s1212_s4 + $0x74] ss:$8 sps:$4 sm:$0xff]   ;;  %v996_v52 = vld [vmem:[%s1212_s4 + $0x20] ss:$8 sps:$4 sm:$0xff]   ;;  %v997_v53 = vld [vmem:[%s1212_s4 + $0x70] ss:$8 sps:$4 sm:$0xff]  }
  0x32   : > { %v998_v54 = vld [vmem:[%s1212_s4 + $0x34] ss:$8 sps:$4 sm:$0xff]   ;;  %v1000_v55 = vld [vmem:[%s1212_s4 + $0x84] ss:$8 sps:$4 sm:$0xff]   ;;  %v1002_v56 = vld [vmem:[%s1212_s4 + $0x30] ss:$8 sps:$4 sm:$0xff]  }
  0x33   : > { %v1003_v57 = vld [vmem:[%s1212_s4 + $0x80] ss:$8 sps:$4 sm:$0xff]   ;;  %v1004_v58 = vld [vmem:[%s1212_s4 + $0x44] ss:$8 sps:$4 sm:$0xff]   ;;  %v1006_v59 = vld [vmem:[%s1212_s4 + $0x94] ss:$8 sps:$4 sm:$0xff]  }
  0x34   : > { %433 = vmatpush1.bf16.msra.mxu0 %v990_v48  ;;  %535 = vmatpush1.bf16.msra.mxu1 %v991_v49  ;;  %v1008_v60 = vld [vmem:[%s1212_s4 + $0x40] ss:$8 sps:$4 sm:$0xff]   ;;  %v1009_v61 = vld [vmem:[%s1212_s4 + $0x90] ss:$8 sps:$4 sm:$0xff]   ;;  %v1012_v62 = vld [vmem:[%s1212_s4 + $0xa4] ss:$8 sps:$4 sm:$0xff]  }
  0x35   : > { %434 = vmatprep.subr.bf16.mxu0 %v992_v50  ;;  %536 = vmatprep.subr.bf16.mxu1 %v994_v51  ;;  %v1015_v63 = vld [vmem:[%s1212_s4 + $0xf4] ss:$8 sps:$4 sm:$0xff]   ;;  %v1010_v1 = vld [vmem:[%s1212_s4 + $0xa0] ss:$8 sps:$4 sm:$0xff]   ;;  %v1013_v2 = vld [vmem:[%s1212_s4 + $0xf0] ss:$8 sps:$4 sm:$0xff]  }
  0x36   : > { %v1018_v3 = vld [vmem:[%s1212_s4 + $0xb4] ss:$8 sps:$4 sm:$0xff]   ;;  %v1021_v4 = vld [vmem:[%s1212_s4 + $0x104] ss:$8 sps:$4 sm:$0xff]   ;;  %v1016_v5 = vld [vmem:[%s1212_s4 + $0xb0] ss:$8 sps:$4 sm:$0xff]  }
  0x37   : > { %v1019_v6 = vld [vmem:[%s1212_s4 + $0x100] ss:$8 sps:$4 sm:$0xff]   ;;  %v1024_v7 = vld [vmem:[%s1212_s4 + $0xc4] ss:$8 sps:$4 sm:$0xff]   ;;  %v1027_v8 = vld [vmem:[%s1212_s4 + $0x114] ss:$8 sps:$4 sm:$0xff]  }
  0x38   : > { %435 = vmatpush1.bf16.msra.mxu0 %v996_v52  ;;  %537 = vmatpush1.bf16.msra.mxu1 %v997_v53  ;;  %v1022_v9 = vld [vmem:[%s1212_s4 + $0xc0] ss:$8 sps:$4 sm:$0xff]   ;;  %v1025_v10 = vld [vmem:[%s1212_s4 + $0x110] ss:$8 sps:$4 sm:$0xff]   ;;  %v1030_v11 = vld [vmem:[%s1212_s4 + $0xd4] ss:$8 sps:$4 sm:$0xff]  }
  0x39   : > { %436 = vmatprep.subr.bf16.mxu0 %v998_v54  ;;  %538 = vmatprep.subr.bf16.mxu1 %v1000_v55  ;;  %v1033_v12 = vld [vmem:[%s1212_s4 + $0x124] ss:$8 sps:$4 sm:$0xff]   ;;  %v1028_v13 = vld [vmem:[%s1212_s4 + $0xd0] ss:$8 sps:$4 sm:$0xff]   ;;  %v1031_v14 = vld [vmem:[%s1212_s4 + $0x120] ss:$8 sps:$4 sm:$0xff]  }
  0x3a   : > { %v1036_v15 = vld [vmem:[%s1212_s4 + $0xe4] ss:$8 sps:$4 sm:$0xff]   ;;  %v1039_v16 = vld [vmem:[%s1212_s4 + $0x134] ss:$8 sps:$4 sm:$0xff]   ;;  %v1034_v17 = vld [vmem:[%s1212_s4 + $0xe0] ss:$8 sps:$4 sm:$0xff]  }
  0x3b   : > { %v1037_v18 = vld [vmem:[%s1212_s4 + $0x130] ss:$8 sps:$4 sm:$0xff]   ;;  %s1286_s7 = smov (!%p359_p8, %s871_s7), 3 }
  0x3c   : > { %437 = vmatpush1.bf16.msra.mxu0 %v1002_v56  ;;  %539 = vmatpush1.bf16.msra.mxu1 %v1003_v57  ;;  %s872_s8 = sshll.u32 %s1286_s7, 2 }
  0x3d   : > { %438 = vmatprep.subr.bf16.mxu0 %v1004_v58  ;;  %540 = vmatprep.subr.bf16.mxu1 %v1006_v59  ;;  %s362_s11 = scalar_lea.vmem %s1281_s3, %s872_s8 }
  0x40   : > { %439 = vmatpush1.bf16.msra.mxu0 %v1008_v60  ;;  %541 = vmatpush1.bf16.msra.mxu1 %v1009_v61 }
  0x41   : > { %636 = vmatprep.subr.bf16.mxu0 %v1012_v62  ;;  %740 = vmatprep.subr.bf16.mxu1 %v1015_v63 }
  0x43   : > { %883 = vmatmul.mubr.msk.bf16.vlgmr.msra.gmra.mrb[0].mxu0 %vm426_vm0, %v365_v0  ;;  %904 = vmatmul.mubr.msk.bf16.vlgmr.msra.gmra.mrb[0].mxu1 %vm426_vm0, %v365_v0 }
  0x44   : > { %637 = vmatpush1.bf16.msra.mxu0 %v1010_v1  ;;  %741 = vmatpush1.bf16.msra.mxu1 %v1013_v2 }
  0x45   : > { %638 = vmatprep.subr.bf16.mxu0 %v1018_v3  ;;  %742 = vmatprep.subr.bf16.mxu1 %v1021_v4 }
  0x46   : > { %668 = vmatprep.mubr.bf16.mxu0 %v1064_v41  ;;  %772 = vmatprep.mubr.bf16.mxu1 %v1064_v41 }
  0x48   : > { %639 = vmatpush1.bf16.msra.mxu0 %v1016_v5  ;;  %743 = vmatpush1.bf16.msra.mxu1 %v1019_v6 }
  0x49   : > { %640 = vmatprep.subr.bf16.mxu0 %v1024_v7  ;;  %744 = vmatprep.subr.bf16.mxu1 %v1027_v8 }
  0x4c   : > { %641 = vmatpush1.bf16.msra.mxu0 %v1022_v9  ;;  %745 = vmatpush1.bf16.msra.mxu1 %v1025_v10 }
  0x4d   : > { %642 = vmatprep.subr.bf16.mxu0 %v1030_v11  ;;  %746 = vmatprep.subr.bf16.mxu1 %v1033_v12 }
  0x50   : > { %643 = vmatpush1.bf16.msra.mxu0 %v1028_v13  ;;  %747 = vmatpush1.bf16.msra.mxu1 %v1031_v14 }
  0x51   : > { %644 = vmatprep.subr.bf16.mxu0 %v1036_v15  ;;  %748 = vmatprep.subr.bf16.mxu1 %v1039_v16 }
  0x54   : > { %645 = vmatpush1.bf16.msra.mxu0 %v1034_v17  ;;  %749 = vmatpush1.bf16.msra.mxu1 %v1037_v18 }
  0x57   : > { %925 = vmatmul.mubr.msk.bf16.vlgmr.msra.gmra.mrb[4].mxu0 %vm426_vm0, %v365_v0  ;;  %946 = vmatmul.mubr.msk.bf16.vlgmr.msra.gmra.mrb[4].mxu1 %vm426_vm0, %v365_v0 }
  0xab   : > { %v787_v29 = vpop.permute.xlu0 %786 }
 0x116   : > { %v464_v19 = vpop.f32.mrb[0].mxu0  ;;  %v566_v20 = vpop.f32.mrb[0].mxu1 }
 0x117   : > { %v573_v21 = vmax.f32 %v464_v19, %v566_v20  ;;  %v466_v22 = vpop.f32.mrb[1].mxu0  ;;  %v568_v23 = vpop.f32.mrb[1].mxu1 }
 0x118   : > { %v574_v24 = vmax.f32 %v466_v22, %v568_v23  ;;  %v468_v25 = vpop.f32.mrb[2].mxu0  ;;  %v570_v26 = vpop.f32.mrb[2].mxu1 }
 0x119   : > { %v469_v27 = vpop.f32.mrb[3].mxu0  ;;  %v571_v28 = vpop.f32.mrb[3].mxu1 }
 0x12a   : > { %v670_v30 = vpop.f32.mrb[4].mxu0  ;;  %v774_v31 = vpop.f32.mrb[4].mxu1 }
 0x12b   : > { %v677_v32 = vmax.f32 %v573_v21, %v670_v30  ;;  %v672_v33 = vpop.f32.mrb[5].mxu0  ;;  %v776_v34 = vpop.f32.mrb[5].mxu1 }
 0x12c   : > { %v678_v35 = vmax.f32 %v574_v24, %v672_v33  ;;  %v674_v36 = vpop.f32.mrb[6].mxu0  ;;  %v778_v37 = vpop.f32.mrb[6].mxu1 }
 0x12d   : > { %v781_v38 = vmax.f32 %v677_v32, %v774_v31  ;;  %v675_v39 = vpop.f32.mrb[7].mxu0  ;;  %v779_v40 = vpop.f32.mrb[7].mxu1 }
 0x12e   : > { %v782_v41 = vmax.f32 %v678_v35, %v776_v34 }
 0x12f   : > { %v789_v42 = vadd.f32 %v787_v29, %v781_v38 }
 0x130   : > { %v790_v43 = vadd.f32 %v787_v29, %v782_v41 }
 0x131   : > { %v791_v44 = vmax.f32 %v789_v42, 0.0 }
 0x132   : > { %v792_v45 = vmax.f32 %v790_v43, 0.0 }
 0x134   : > { %v951_v46 = vpack.c.bf16 %v792_v45, %v791_v44 }
 0x136   : > { %801 = vst [vmem:[%s362_s11] sm:$0xff] %v951_v46 }
 0x137 PF: > { %p10_p9 = scmp.ge.s32.totalorder %s1102_s16, 4   ;;  %s1282_s12 = smov %s1058_s13 }
 0x138   : > { %s1283_s13 = smov %s1111_s19  ;;  %s1284_s14 = smov %s1102_s16 }
 0x139   :  { %12 = sbr.rel (!%p10_p9) target bundleno = 2 (0x2), region = 108 }

// kernel: net_forward.4
= control target key start
LH: loop header
LB: loop body
LE: loop exit
PB: predicated region body
PF: predicated region fallthrough
CT: control target
= control target key end

     0   :  { %v1230_v1 = vmov 0   ;;  %vm176_vm0 = vcmask 588800   ;;  %vm180_vm1 = vcmask 1043456   ;;  %s1587_s2 = inlined_call_operand.vmem [shape: bf16[4,200,256], index: 2, kind: input, shape index: {}]   ;;  %s1588_s0 = inlined_call_operand.vmem [shape: bf16[16,200], index: 0, kind: input, shape index: {}]   ;;  %s1589_s1 = inlined_call_operand.vmem [shape: f32[16,1], index: 1, kind: input, shape index: {}]   ;;  %s1590_s3 = inlined_call_operand.vmem [shape: bf16[16,256], index: 3, kind: output, shape index: {}]  }
   0x1   :  { %v1075_v0 = vld [vmem:[%s1587_s2 + $0x4] ss:$8 sps:$4 sm:$0xff]   ;;  %1074 = vset.pattern.permute.xlu0 %v1230_v1  ;;  %v1079_v3 = vld [vmem:[%s1587_s2] ss:$8 sps:$4 sm:$0xff]   ;;  %v1081_v5 = vld [vmem:[%s1587_s2 + $0x14] ss:$8 sps:$4 sm:$0xff]  }
   0x2   :  { %v1077_v2 = vld [vmem:[%s1587_s2 + $0xcc] ss:$8 sps:$4 sm:$0xff]   ;;  %187 = vmatprep.subr.bf16.mxu0 %v1075_v0  ;;  %v1080_v4 = vld [vmem:[%s1587_s2 + $0xc8] ss:$8 sps:$4 sm:$0xff]   ;;  %v1083_v6 = vld [vmem:[%s1587_s2 + $0xdc] ss:$8 sps:$4 sm:$0xff]  }
   0x3   :  { %387 = vmatprep.subr.bf16.mxu1 %v1077_v2  ;;  %188 = vmatpush1.bf16.msra.mxu0 %v1079_v3  ;;  %v1085_v7 = vld [vmem:[%s1587_s2 + $0x10] ss:$8 sps:$4 sm:$0xff]   ;;  %v1087_v9 = vld [vmem:[%s1587_s2 + $0x24] ss:$8 sps:$4 sm:$0xff]   ;;  %v1091_v11 = vld [vmem:[%s1587_s2 + $0x20] ss:$8 sps:$4 sm:$0xff]  }
   0x4   :  { %388 = vmatpush1.bf16.msra.mxu1 %v1080_v4  ;;  %189 = vmatprep.subr.bf16.mxu0 %v1081_v5  ;;  %v1086_v8 = vld [vmem:[%s1587_s2 + $0xd8] ss:$8 sps:$4 sm:$0xff]   ;;  %v1089_v10 = vld [vmem:[%s1587_s2 + $0xec] ss:$8 sps:$4 sm:$0xff]   ;;  %v1092_v12 = vld [vmem:[%s1587_s2 + $0xe8] ss:$8 sps:$4 sm:$0xff]  }
   0x5   :  { %389 = vmatprep.subr.bf16.mxu1 %v1083_v6  ;;  %v1093_v13 = vld [vmem:[%s1587_s2 + $0x34] ss:$8 sps:$4 sm:$0xff]   ;;  %v1097_v15 = vld [vmem:[%s1587_s2 + $0x30] ss:$8 sps:$4 sm:$0xff]   ;;  %v1099_v17 = vld [vmem:[%s1587_s2 + $0x44] ss:$8 sps:$4 sm:$0xff]  }
   0x6   :  { %v1095_v14 = vld [vmem:[%s1587_s2 + $0xfc] ss:$8 sps:$4 sm:$0xff]   ;;  %v1098_v16 = vld [vmem:[%s1587_s2 + $0xf8] ss:$8 sps:$4 sm:$0xff]   ;;  %v1101_v18 = vld [vmem:[%s1587_s2 + $0x10c] ss:$8 sps:$4 sm:$0xff]  }
   0x7   :  { %190 = vmatpush1.bf16.msra.mxu0 %v1085_v7  ;;  %v1103_v19 = vld [vmem:[%s1587_s2 + $0x40] ss:$8 sps:$4 sm:$0xff]   ;;  %v1105_v21 = vld [vmem:[%s1587_s2 + $0x54] ss:$8 sps:$4 sm:$0xff]   ;;  %v1109_v23 = vld [vmem:[%s1587_s2 + $0x50] ss:$8 sps:$4 sm:$0xff]  }
   0x8   :  { %390 = vmatpush1.bf16.msra.mxu1 %v1086_v8  ;;  %191 = vmatprep.subr.bf16.mxu0 %v1087_v9  ;;  %v1104_v20 = vld [vmem:[%s1587_s2 + $0x108] ss:$8 sps:$4 sm:$0xff]   ;;  %v1107_v22 = vld [vmem:[%s1587_s2 + $0x11c] ss:$8 sps:$4 sm:$0xff]   ;;  %v1110_v24 = vld [vmem:[%s1587_s2 + $0x118] ss:$8 sps:$4 sm:$0xff]  }
   0x9   :  { %391 = vmatprep.subr.bf16.mxu1 %v1089_v10  ;;  %v1111_v25 = vld [vmem:[%s1587_s2 + $0x64] ss:$8 sps:$4 sm:$0xff]   ;;  %v1115_v27 = vld [vmem:[%s1587_s2 + $0x60] ss:$8 sps:$4 sm:$0xff]   ;;  %v1117_v29 = vld [vmem:[%s1587_s2 + $0x74] ss:$8 sps:$4 sm:$0xff]  }
   0xa   :  { %v1113_v26 = vld [vmem:[%s1587_s2 + $0x12c] ss:$8 sps:$4 sm:$0xff]   ;;  %v1116_v28 = vld [vmem:[%s1587_s2 + $0x128] ss:$8 sps:$4 sm:$0xff]   ;;  %v1119_v30 = vld [vmem:[%s1587_s2 + $0x13c] ss:$8 sps:$4 sm:$0xff]  }
   0xb   :  { %192 = vmatpush1.bf16.msra.mxu0 %v1091_v11  ;;  %v1121_v31 = vld [vmem:[%s1587_s2 + $0x70] ss:$8 sps:$4 sm:$0xff]   ;;  %v1123_v33 = vld [vmem:[%s1587_s2 + $0x84] ss:$8 sps:$4 sm:$0xff]   ;;  %v1127_v35 = vld [vmem:[%s1587_s2 + $0x80] ss:$8 sps:$4 sm:$0xff]  }
   0xc   :  { %392 = vmatpush1.bf16.msra.mxu1 %v1092_v12  ;;  %193 = vmatprep.subr.bf16.mxu0 %v1093_v13  ;;  %v1122_v32 = vld [vmem:[%s1587_s2 + $0x138] ss:$8 sps:$4 sm:$0xff]   ;;  %v1125_v34 = vld [vmem:[%s1587_s2 + $0x14c] ss:$8 sps:$4 sm:$0xff]   ;;  %v1128_v36 = vld [vmem:[%s1587_s2 + $0x148] ss:$8 sps:$4 sm:$0xff]  }
   0xd   :  { %393 = vmatprep.subr.bf16.mxu1 %v1095_v14  ;;  %v1129_v37 = vld [vmem:[%s1587_s2 + $0x94] ss:$8 sps:$4 sm:$0xff]   ;;  %v1151_v39 = vld [vmem:[%s1588_s0 + $0x4] ss:$8 sps:$4 sm:$0xff]   ;;  %v1133_v40 = vld [vmem:[%s1587_s2 + $0x90] ss:$8 sps:$4 sm:$0xff]  }
   0xe   :  { %v1131_v38 = vld [vmem:[%s1587_s2 + $0x15c] ss:$8 sps:$4 sm:$0xff]   ;;  %909 = vmatprep.mubr.msk.bf16.mxu0 %vm176_vm0, %v1151_v39  ;;  %962 = vmatprep.mubr.msk.bf16.mxu1 %vm176_vm0, %v1151_v39  ;;  %v1134_v41 = vld [vmem:[%s1587_s2 + $0x158] ss:$8 sps:$4 sm:$0xff]   ;;  %v1137_v43 = vld [vmem:[%s1587_s2 + $0x16c] ss:$8 sps:$4 sm:$0xff]  }
   0xf   :  { %194 = vmatpush1.bf16.msra.mxu0 %v1097_v15  ;;  %v1135_v42 = vld [vmem:[%s1587_s2 + $0xa4] ss:$8 sps:$4 sm:$0xff]   ;;  %v1139_v44 = vld [vmem:[%s1587_s2 + $0xa0] ss:$8 sps:$4 sm:$0xff]   ;;  %v1141_v46 = vld [vmem:[%s1587_s2 + $0xb4] ss:$8 sps:$4 sm:$0xff]  }
  0x10   :  { %394 = vmatpush1.bf16.msra.mxu1 %v1098_v16  ;;  %195 = vmatprep.subr.bf16.mxu0 %v1099_v17  ;;  %v1140_v45 = vld [vmem:[%s1587_s2 + $0x168] ss:$8 sps:$4 sm:$0xff]   ;;  %v1143_v47 = vld [vmem:[%s1587_s2 + $0x17c] ss:$8 sps:$4 sm:$0xff]   ;;  %v1146_v51 = vld [vmem:[%s1587_s2 + $0x178] ss:$8 sps:$4 sm:$0xff]  }
  0x11   :  { %395 = vmatprep.subr.bf16.mxu1 %v1101_v18  ;;  %v41_v48 = vld [vmem:[%s1587_s2 + $0xc0] sm:$0xff]  ;;  %v934_v49 = vld [vmem:[%s1587_s2 + $0x188] sm:$0xff]  ;;  %v1145_v50 = vld [vmem:[%s1587_s2 + $0xb0] ss:$8 sps:$4 sm:$0xff]  }
  0x12   :  { %v906_v52 = vcombine.low %v41_v48, %v41_v48  ;;  %v907_v53 = vcombine.high %v41_v48, %v41_v48  ;;  %v960_v54 = vcombine.high %v934_v49, %v934_v49  ;;  %v959_v55 = vcombine.low %v934_v49, %v934_v49  ;;  %v1156_v58 = vld [vmem:[%s1587_s2 + $0x194] ss:$8 sps:$4 sm:$0xff]   ;;  %v1419_v60 = vld [vmem:[%s1588_s0] ss:$8 sps:$4 sm:$0xff]   ;;  %v1154_v61 = vld [vmem:[%s1587_s2 + $0x190] ss:$8 sps:$4 sm:$0xff]  }
  0x13   :  { %196 = vmatpush1.bf16.msra.mxu0 %v1103_v19  ;;  %v1159_v59 = vld [vmem:[%s1587_s2 + $0x25c] ss:$8 sps:$4 sm:$0xff]   ;;  %v1157_v62 = vld [vmem:[%s1587_s2 + $0x258] ss:$8 sps:$4 sm:$0xff]   ;;  %v1165_v0 = vld [vmem:[%s1587_s2 + $0x26c] ss:$8 sps:$4 sm:$0xff]  }
  0x14   :  { %396 = vmatpush1.bf16.msra.mxu1 %v1104_v20  ;;  %197 = vmatprep.subr.bf16.mxu0 %v1105_v21  ;;  %v182_v56 = vsel %vm180_vm1, %v906_v52, 0  ;;  %v382_v57 = vsel %vm180_vm1, %v959_v55, 0  ;;  %v1162_v63 = vld [vmem:[%s1587_s2 + $0x1a4] ss:$8 sps:$4 sm:$0xff]   ;;  %v1160_v1 = vld [vmem:[%s1587_s2 + $0x1a0] ss:$8 sps:$4 sm:$0xff]  }
  0x15   :  { %397 = vmatprep.subr.bf16.mxu1 %v1107_v22  ;;  %v1163_v2 = vld [vmem:[%s1587_s2 + $0x268] ss:$8 sps:$4 sm:$0xff]   ;;  %v1168_v3 = vld [vmem:[%s1587_s2 + $0x1b4] ss:$8 sps:$4 sm:$0xff]   ;;  %v1169_v6 = vld [vmem:[%s1587_s2 + $0x278] ss:$8 sps:$4 sm:$0xff]  }
  0x16   :  { %v1171_v4 = vld [vmem:[%s1587_s2 + $0x27c] ss:$8 sps:$4 sm:$0xff]   ;;  %v1166_v5 = vld [vmem:[%s1587_s2 + $0x1b0] ss:$8 sps:$4 sm:$0xff]   ;;  %v1177_v8 = vld [vmem:[%s1587_s2 + $0x28c] ss:$8 sps:$4 sm:$0xff]  }
  0x17   :  { %198 = vmatpush1.bf16.msra.mxu0 %v1109_v23  ;;  %v1174_v7 = vld [vmem:[%s1587_s2 + $0x1c4] ss:$8 sps:$4 sm:$0xff]   ;;  %v1172_v9 = vld [vmem:[%s1587_s2 + $0x1c0] ss:$8 sps:$4 sm:$0xff]   ;;  %v1180_v11 = vld [vmem:[%s1587_s2 + $0x1d4] ss:$8 sps:$4 sm:$0xff]  }
  0x18   :  { %398 = vmatpush1.bf16.msra.mxu1 %v1110_v24  ;;  %199 = vmatprep.subr.bf16.mxu0 %v1111_v25  ;;  %v1175_v10 = vld [vmem:[%s1587_s2 + $0x288] ss:$8 sps:$4 sm:$0xff]   ;;  %v1183_v12 = vld [vmem:[%s1587_s2 + $0x29c] ss:$8 sps:$4 sm:$0xff]   ;;  %v1181_v15 = vld [vmem:[%s1587_s2 + $0x298] ss:$8 sps:$4 sm:$0xff]  }
  0x19   :  { %399 = vmatprep.subr.bf16.mxu1 %v1113_v26  ;;  %v842_v13 = vld [vmem:[%s1589_s1] sm:$0xff]  ;;  %v1178_v14 = vld [vmem:[%s1587_s2 + $0x1d0] ss:$8 sps:$4 sm:$0xff]   ;;  %v843_v16 = vld [vmem:[%s1589_s1 + $0x8] sm:$0xff] }
  0x1a   :  { %846 = vperm.xlu0 %1074, %v842_v13   ;;  %v1186_v17 = vld [vmem:[%s1587_s2 + $0x1e4] ss:$8 sps:$4 sm:$0xff]   ;;  %v1184_v19 = vld [vmem:[%s1587_s2 + $0x1e0] ss:$8 sps:$4 sm:$0xff]   ;;  %v1192_v21 = vld [vmem:[%s1587_s2 + $0x1f4] ss:$8 sps:$4 sm:$0xff]  }
  0x1b   :  { %200 = vmatpush1.bf16.msra.mxu0 %v1115_v27  ;;  %v1189_v18 = vld [vmem:[%s1587_s2 + $0x2ac] ss:$8 sps:$4 sm:$0xff]   ;;  %v1187_v20 = vld [vmem:[%s1587_s2 + $0x2a8] ss:$8 sps:$4 sm:$0xff]   ;;  %v1195_v22 = vld [vmem:[%s1587_s2 + $0x2bc] ss:$8 sps:$4 sm:$0xff]  }
  0x1c   :  { %400 = vmatpush1.bf16.msra.mxu1 %v1116_v28  ;;  %201 = vmatprep.subr.bf16.mxu0 %v1117_v29  ;;  %v1190_v23 = vld [vmem:[%s1587_s2 + $0x1f0] ss:$8 sps:$4 sm:$0xff]   ;;  %v1198_v25 = vld [vmem:[%s1587_s2 + $0x204] ss:$8 sps:$4 sm:$0xff]   ;;  %v1196_v27 = vld [vmem:[%s1587_s2 + $0x200] ss:$8 sps:$4 sm:$0xff]  }
  0x1d   :  { %401 = vmatprep.subr.bf16.mxu1 %v1119_v30  ;;  %v1193_v24 = vld [vmem:[%s1587_s2 + $0x2b8] ss:$8 sps:$4 sm:$0xff]   ;;  %v1201_v26 = vld [vmem:[%s1587_s2 + $0x2cc] ss:$8 sps:$4 sm:$0xff]   ;;  %v1199_v28 = vld [vmem:[%s1587_s2 + $0x2c8] ss:$8 sps:$4 sm:$0xff]  }
  0x1e   :  { %851 = vperm.xlu0 %1074, %v843_v16   ;;  %v1204_v29 = vld [vmem:[%s1587_s2 + $0x214] ss:$8 sps:$4 sm:$0xff]  }
  0x1f   :  { %202 = vmatpush1.bf16.msra.mxu0 %v1121_v31  ;;  %v1207_v30 = vld [vmem:[%s1587_s2 + $0x2dc] ss:$8 sps:$4 sm:$0xff]   ;;  %v1202_v31 = vld [vmem:[%s1587_s2 + $0x210] ss:$8 sps:$4 sm:$0xff]  }
  0x20   :  { %402 = vmatpush1.bf16.msra.mxu1 %v1122_v32  ;;  %203 = vmatprep.subr.bf16.mxu0 %v1123_v33  ;;  %v1205_v32 = vld [vmem:[%s1587_s2 + $0x2d8] ss:$8 sps:$4 sm:$0xff]   ;;  %v1210_v33 = vld [vmem:[%s1587_s2 + $0x224] ss:$8 sps:$4 sm:$0xff]  }
  0x21   :  { %403 = vmatprep.subr.bf16.mxu1 %v1125_v34  ;;  %v1213_v34 = vld [vmem:[%s1587_s2 + $0x2ec] ss:$8 sps:$4 sm:$0xff]  }
  0x23   :  { %204 = vmatpush1.bf16.msra.mxu0 %v1127_v35  ;;  %v1208_v35 = vld [vmem:[%s1587_s2 + $0x220] ss:$8 sps:$4 sm:$0xff]  }
  0x24   :  { %404 = vmatpush1.bf16.msra.mxu1 %v1128_v36  ;;  %205 = vmatprep.subr.bf16.mxu0 %v1129_v37  ;;  %v1211_v36 = vld [vmem:[%s1587_s2 + $0x2e8] ss:$8 sps:$4 sm:$0xff]   ;;  %v1216_v37 = vld [vmem:[%s1587_s2 + $0x234] ss:$8 sps:$4 sm:$0xff]  }
  0x25   :  { %405 = vmatprep.subr.bf16.mxu1 %v1131_v38  ;;  %v1219_v38 = vld [vmem:[%s1587_s2 + $0x2fc] ss:$8 sps:$4 sm:$0xff]  }
  0x27   :  { %206 = vmatpush1.bf16.msra.mxu0 %v1133_v40  ;;  %v1217_v40 = vld [vmem:[%s1587_s2 + $0x2f8] ss:$8 sps:$4 sm:$0xff]  }
  0x28   :  { %406 = vmatpush1.bf16.msra.mxu1 %v1134_v41  ;;  %207 = vmatprep.subr.bf16.mxu0 %v1135_v42  ;;  %v1222_v41 = vld [vmem:[%s1587_s2 + $0x244] ss:$8 sps:$4 sm:$0xff]  }
  0x29   :  { %407 = vmatprep.subr.bf16.mxu1 %v1137_v43  ;;  %v1225_v42 = vld [vmem:[%s1587_s2 + $0x30c] ss:$8 sps:$4 sm:$0xff]  }
  0x2a   :  { %v987_v43 = vld [vmem:[%s1587_s2 + $0x250] sm:$0xff] }
  0x2b   :  { %208 = vmatpush1.bf16.msra.mxu0 %v1139_v44  ;;  %v1040_v44 = vld [vmem:[%s1587_s2 + $0x318] sm:$0xff]  ;;  %v1012_v49 = vcombine.low %v987_v43, %v987_v43 }
  0x2c   :  { %408 = vmatpush1.bf16.msra.mxu1 %v1140_v45  ;;  %209 = vmatprep.subr.bf16.mxu0 %v1141_v46  ;;  %v1220_v45 = vld [vmem:[%s1587_s2 + $0x240] ss:$8 sps:$4 sm:$0xff]   ;;  %v1066_v48 = vcombine.high %v1040_v44, %v1040_v44 }
  0x2d   :  { %409 = vmatprep.subr.bf16.mxu1 %v1143_v47  ;;  %v1223_v46 = vld [vmem:[%s1587_s2 + $0x308] ss:$8 sps:$4 sm:$0xff]   ;;  %v1013_v47 = vcombine.high %v987_v43, %v987_v43 }
  0x2f   :  { %210 = vmatpush1.bf16.msra.mxu0 %v1145_v50  ;;  %v1065_v50 = vcombine.low %v1040_v44, %v1040_v44 }
  0x30   :  { %410 = vmatpush1.bf16.msra.mxu1 %v1146_v51  ;;  %908 = vmatprep.subr.msk.bf16.mxu0 %vm180_vm1, %v907_v53  ;;  %v586_v51 = vsel %vm180_vm1, %v1012_v49, 0 }
  0x31   :  { %961 = vmatprep.subr.msk.bf16.mxu1 %vm180_vm1, %v960_v54  ;;  %v790_v52 = vsel %vm180_vm1, %v1065_v50, 0 }
  0x33   :  { %212 = vmatpush1.bf16.msra.mxu0 %v182_v56 }
  0x34   :  { %412 = vmatpush1.bf16.msra.mxu1 %v382_v57  ;;  %591 = vmatprep.subr.bf16.mxu0 %v1156_v58 }
  0x35   :  { %795 = vmatprep.subr.bf16.mxu1 %v1159_v59 }
  0x36   :  { %220 = vmatmul.mubr.bf16.vlgmr.msra.gmra.mrb[0].mxu0 %v1419_v60 }
  0x37   :  { %420 = vmatmul.mubr.bf16.vlgmr.msra.gmra.mrb[0].mxu1 %v1419_v60  ;;  %592 = vmatpush1.bf16.msra.mxu0 %v1154_v61 }
  0x38   :  { %796 = vmatpush1.bf16.msra.mxu1 %v1157_v62  ;;  %593 = vmatprep.subr.bf16.mxu0 %v1162_v63 }
  0x39   :  { %797 = vmatprep.subr.bf16.mxu1 %v1165_v0  ;;  %1015 = vmatprep.mubr.msk.bf16.mxu0 %vm176_vm0, %v1151_v39 }
  0x3a   :  { %1068 = vmatprep.mubr.msk.bf16.mxu1 %vm176_vm0, %v1151_v39  ;;  %v1214_v39 = vld [vmem:[%s1587_s2 + $0x230] ss:$8 sps:$4 sm:$0xff]  }
  0x3b   :  { %594 = vmatpush1.bf16.msra.mxu0 %v1160_v1 }
  0x3c   :  { %798 = vmatpush1.bf16.msra.mxu1 %v1163_v2  ;;  %595 = vmatprep.subr.bf16.mxu0 %v1168_v3 }
  0x3d   :  { %799 = vmatprep.subr.bf16.mxu1 %v1171_v4 }
  0x3f   :  { %596 = vmatpush1.bf16.msra.mxu0 %v1166_v5 }
  0x40   :  { %800 = vmatpush1.bf16.msra.mxu1 %v1169_v6  ;;  %597 = vmatprep.subr.bf16.mxu0 %v1174_v7 }
  0x41   :  { %801 = vmatprep.subr.bf16.mxu1 %v1177_v8 }
  0x43   :  { %598 = vmatpush1.bf16.msra.mxu0 %v1172_v9 }
  0x44   :  { %802 = vmatpush1.bf16.msra.mxu1 %v1175_v10  ;;  %599 = vmatprep.subr.bf16.mxu0 %v1180_v11 }
  0x45   :  { %803 = vmatprep.subr.bf16.mxu1 %v1183_v12 }
  0x47   :  { %600 = vmatpush1.bf16.msra.mxu0 %v1178_v14 }
  0x48   :  { %804 = vmatpush1.bf16.msra.mxu1 %v1181_v15  ;;  %601 = vmatprep.subr.bf16.mxu0 %v1186_v17 }
  0x49   :  { %805 = vmatprep.subr.bf16.mxu1 %v1189_v18 }
  0x4b   :  { %602 = vmatpush1.bf16.msra.mxu0 %v1184_v19 }
  0x4c   :  { %806 = vmatpush1.bf16.msra.mxu1 %v1187_v20  ;;  %603 = vmatprep.subr.bf16.mxu0 %v1192_v21 }
  0x4d   :  { %807 = vmatprep.subr.bf16.mxu1 %v1195_v22 }
  0x4f   :  { %604 = vmatpush1.bf16.msra.mxu0 %v1190_v23 }
  0x50   :  { %808 = vmatpush1.bf16.msra.mxu1 %v1193_v24  ;;  %605 = vmatprep.subr.bf16.mxu0 %v1198_v25 }
  0x51   :  { %809 = vmatprep.subr.bf16.mxu1 %v1201_v26 }
  0x53   :  { %606 = vmatpush1.bf16.msra.mxu0 %v1196_v27 }
  0x54   :  { %810 = vmatpush1.bf16.msra.mxu1 %v1199_v28  ;;  %607 = vmatprep.subr.bf16.mxu0 %v1204_v29 }
  0x55   :  { %811 = vmatprep.subr.bf16.mxu1 %v1207_v30 }
  0x57   :  { %608 = vmatpush1.bf16.msra.mxu0 %v1202_v31 }
  0x58   :  { %812 = vmatpush1.bf16.msra.mxu1 %v1205_v32  ;;  %609 = vmatprep.subr.bf16.mxu0 %v1210_v33 }
  0x59   :  { %813 = vmatprep.subr.bf16.mxu1 %v1213_v34 }
  0x5b   :  { %610 = vmatpush1.bf16.msra.mxu0 %v1208_v35 }
  0x5c   :  { %814 = vmatpush1.bf16.msra.mxu1 %v1211_v36  ;;  %611 = vmatprep.subr.bf16.mxu0 %v1216_v37 }
  0x5d   :  { %815 = vmatprep.subr.bf16.mxu1 %v1219_v38 }
  0x5f   :  { %612 = vmatpush1.bf16.msra.mxu0 %v1214_v39 }
  0x60   :  { %816 = vmatpush1.bf16.msra.mxu1 %v1217_v40  ;;  %613 = vmatprep.subr.bf16.mxu0 %v1222_v41 }
  0x61   :  { %817 = vmatprep.subr.bf16.mxu1 %v1225_v42 }
  0x63   :  { %614 = vmatpush1.bf16.msra.mxu0 %v1220_v45 }
  0x64   :  { %818 = vmatpush1.bf16.msra.mxu1 %v1223_v46  ;;  %1014 = vmatprep.subr.msk.bf16.mxu0 %vm180_vm1, %v1013_v47 }
  0x65   :  { %1067 = vmatprep.subr.msk.bf16.mxu1 %vm180_vm1, %v1066_v48 }
  0x67   :  { %616 = vmatpush1.bf16.msra.mxu0 %v586_v51 }
  0x68   :  { %820 = vmatpush1.bf16.msra.mxu1 %v790_v52 }
  0x6a   :  { %624 = vmatmul.mubr.bf16.vlgmr.msra.gmra.mrb[4].mxu0 %v1419_v60 }
  0x6b   :  { %828 = vmatmul.mubr.bf16.vlgmr.msra.gmra.mrb[4].mxu1 %v1419_v60 }
  0x99   :  { %v847_v2 = vpop.permute.xlu0 %846 }
  0x9d   :  { %v852_v19 = vpop.permute.xlu0 %851 }
 0x109   :  { %v221_v53 = vpop.f32.mrb[0].mxu0 }
 0x10a   :  { %v421_v54 = vpop.f32.mrb[0].mxu1  ;;  %v223_v56 = vpop.f32.mrb[1].mxu0 }
 0x10b   :  { %v430_v55 = vmax.f32 %v221_v53, %v421_v54  ;;  %v423_v57 = vpop.f32.mrb[1].mxu1  ;;  %v225_v59 = vpop.f32.mrb[2].mxu0 }
 0x10c   :  { %v431_v58 = vmax.f32 %v223_v56, %v423_v57  ;;  %v425_v61 = vpop.f32.mrb[2].mxu1  ;;  %v227_v63 = vpop.f32.mrb[3].mxu0 }
 0x10d   :  { %v432_v62 = vmax.f32 %v225_v59, %v425_v61  ;;  %v427_v0 = vpop.f32.mrb[3].mxu1 }
 0x10e   :  { %v433_v1 = vmax.f32 %v227_v63, %v427_v0 }
 0x13d   :  { %v625_v3 = vpop.f32.mrb[4].mxu0 }
 0x13e   :  { %v829_v4 = vpop.f32.mrb[4].mxu1  ;;  %v634_v5 = vmax.f32 %v430_v55, %v625_v3  ;;  %v627_v6 = vpop.f32.mrb[5].mxu0 }
 0x13f   :  { %v831_v7 = vpop.f32.mrb[5].mxu1  ;;  %v635_v8 = vmax.f32 %v431_v58, %v627_v6  ;;  %v629_v60 = vpop.f32.mrb[6].mxu0 }
 0x140   :  { %v833_v9 = vpop.f32.mrb[6].mxu1  ;;  %v838_v10 = vmax.f32 %v634_v5, %v829_v4  ;;  %v636_v11 = vmax.f32 %v432_v62, %v629_v60  ;;  %v631_v12 = vpop.f32.mrb[7].mxu0 }
 0x141   :  { %v835_v13 = vpop.f32.mrb[7].mxu1  ;;  %v839_v14 = vmax.f32 %v635_v8, %v831_v7  ;;  %v637_v15 = vmax.f32 %v433_v1, %v631_v12 }
 0x142   :  { %v854_v16 = vadd.f32 %v847_v2, %v838_v10  ;;  %v840_v17 = vmax.f32 %v636_v11, %v833_v9 }
 0x143   :  { %v855_v18 = vadd.f32 %v847_v2, %v839_v14  ;;  %v841_v20 = vmax.f32 %v637_v15, %v835_v13 }
 0x144   :  { %v858_v21 = vmax.f32 %v854_v16, 0.0  ;;  %v856_v22 = vadd.f32 %v852_v19, %v840_v17 }
 0x145   :  { %v859_v23 = vmax.f32 %v855_v18, 0.0  ;;  %v857_v24 = vadd.f32 %v852_v19, %v841_v20 }
 0x146   :  { %v860_v25 = vmax.f32 %v856_v22, 0.0 }
 0x147   :  { %v1071_v26 = vpack.c.bf16 %v859_v23, %v858_v21  ;;  %v861_v27 = vmax.f32 %v857_v24, 0.0 }
 0x149   :  { %874 = vst [vmem:[%s1590_s3] sm:$0xff] %v1071_v26  ;;  %v1072_v28 = vpack.c.bf16 %v861_v27, %v860_v25 }
 0x14b   :  { %875 = vst [vmem:[%s1590_s3 + $0x8] sm:$0xff] %v1072_v28 }

// kernel: net_forward.5
= control target key start
LH: loop header
LB: loop body
LE: loop exit
PB: predicated region body
PF: predicated region fallthrough
CT: control target
= control target key end

     0   :  { %v1543_v8 = vmov 0   ;;  %vm593_vm0 = vcmask 130048   ;;  %vm1019_vm1 = vcmask 1043456   ;;  %vm1000_vm2 = vcmask 982016   ;;  %s2118_s0 = inlined_call_operand.vmem [shape: bf16[400,256], index: 0, kind: input, shape index: {}]   ;;  %s2119_s1 = inlined_call_operand.vmem [shape: bf16[120,400], index: 1, kind: input, shape index: {}]   ;;  %s2120_s2 = inlined_call_operand.vmem [shape: f32[120,1], index: 2, kind: input, shape index: {}]   ;;  %s2121_s4 = inlined_call_operand.vmem [shape: f32[96,1], index: 4, kind: input, shape index: {}]   ;;  %s2122_s6 = inlined_call_operand.vmem [shape: f32[16,1], index: 6, kind: input, shape index: {}]   ;;  %s2123_s3 = inlined_call_operand.vmem [shape: bf16[96,120], index: 3, kind: input, shape index: {}]   ;;  %s2124_s5 = inlined_call_operand.vmem [shape: bf16[16,96], index: 5, kind: input, shape index: {}]   ;;  %s2125_s7 = inlined_call_operand.vmem [shape: f32[16,256], index: 7, kind: output, shape index: {}]  }
   0x1   :  { %v1415_v0 = vld [vmem:[%s2118_s0 + $0x4] ss:$8 sps:$4 sm:$0xff]   ;;  %v1417_v1 = vld [vmem:[%s2118_s0] ss:$8 sps:$4 sm:$0xff]   ;;  %v1418_v2 = vld [vmem:[%s2118_s0 + $0x14] ss:$8 sps:$4 sm:$0xff]   ;;  %1413 = vset.pattern.permute.xlu0 %v1543_v8  ;;  %1414 = vset.pattern.permute.xlu1 %v1543_v8 }
   0x2   :  { %618 = vmatprep.subr.bf16.mxu0 %v1415_v0  ;;  %v1420_v3 = vld [vmem:[%s2118_s0 + $0x10] ss:$8 sps:$4 sm:$0xff]   ;;  %v1421_v4 = vld [vmem:[%s2118_s0 + $0x24] ss:$8 sps:$4 sm:$0xff]   ;;  %v1423_v5 = vld [vmem:[%s2118_s0 + $0x20] ss:$8 sps:$4 sm:$0xff]  }
   0x3   :  { %619 = vmatpush1.bf16.msra.mxu0 %v1417_v1  ;;  %v1424_v6 = vld [vmem:[%s2118_s0 + $0x34] ss:$8 sps:$4 sm:$0xff]   ;;  %v1426_v7 = vld [vmem:[%s2118_s0 + $0x30] ss:$8 sps:$4 sm:$0xff]   ;;  %v1427_v9 = vld [vmem:[%s2118_s0 + $0x44] ss:$8 sps:$4 sm:$0xff]  }
   0x4   :  { %620 = vmatprep.subr.bf16.mxu0 %v1418_v2  ;;  %v1429_v10 = vld [vmem:[%s2118_s0 + $0x40] ss:$8 sps:$4 sm:$0xff]   ;;  %v1430_v11 = vld [vmem:[%s2118_s0 + $0x54] ss:$8 sps:$4 sm:$0xff]   ;;  %v1622_v12 = vld [vmem:[%s2118_s0 + $0x104] ss:$8 sps:$4 sm:$0xff]  }
   0x5   :  { %v1627_v13 = vld [vmem:[%s2118_s0 + $0x100] ss:$8 sps:$4 sm:$0xff]   ;;  %v1432_v14 = vld [vmem:[%s2118_s0 + $0x50] ss:$8 sps:$4 sm:$0xff]   ;;  %1334 = vmatprep.subr.bf16.mxu1 %v1622_v12  ;;  %v1637_v15 = vld [vmem:[%s2118_s0 + $0x114] ss:$8 sps:$4 sm:$0xff]  }
   0x6   :  { %1343 = vmatpush1.bf16.msra.mxu1 %v1627_v13  ;;  %v1642_v16 = vld [vmem:[%s2118_s0 + $0x110] ss:$8 sps:$4 sm:$0xff]   ;;  %v1433_v17 = vld [vmem:[%s2118_s0 + $0x64] ss:$8 sps:$4 sm:$0xff]   ;;  %v1435_v18 = vld [vmem:[%s2118_s0 + $0x60] ss:$8 sps:$4 sm:$0xff]  }
   0x7   :  { %621 = vmatpush1.bf16.msra.mxu0 %v1420_v3  ;;  %1335 = vmatprep.subr.bf16.mxu1 %v1637_v15  ;;  %v1654_v19 = vld [vmem:[%s2118_s0 + $0x124] ss:$8 sps:$4 sm:$0xff]   ;;  %v1436_v20 = vld [vmem:[%s2118_s0 + $0x74] ss:$8 sps:$4 sm:$0xff]   ;;  %v1663_v21 = vld [vmem:[%s2118_s0 + $0x120] ss:$8 sps:$4 sm:$0xff]  }
   0x8   :  { %622 = vmatprep.subr.bf16.mxu0 %v1421_v4  ;;  %v1669_v22 = vld [vmem:[%s2118_s0 + $0x134] ss:$8 sps:$4 sm:$0xff]   ;;  %v1438_v23 = vld [vmem:[%s2118_s0 + $0x70] ss:$8 sps:$4 sm:$0xff]   ;;  %v1439_v24 = vld [vmem:[%s2118_s0 + $0x84] ss:$8 sps:$4 sm:$0xff]  }
   0x9   :  { %v1681_v25 = vld [vmem:[%s2118_s0 + $0x130] ss:$8 sps:$4 sm:$0xff]   ;;  %v1687_v26 = vld [vmem:[%s2118_s0 + $0x144] ss:$8 sps:$4 sm:$0xff]   ;;  %v1441_v28 = vld [vmem:[%s2118_s0 + $0x80] ss:$8 sps:$4 sm:$0xff]  }
   0xa   :  { %1344 = vmatpush1.bf16.msra.mxu1 %v1642_v16  ;;  %v1479_v27 = vld [vmem:[%s2119_s1 + $0x4] ss:$16 sps:$4 sm:$0xff]   ;;  %v1699_v29 = vld [vmem:[%s2118_s0 + $0x140] ss:$8 sps:$4 sm:$0xff]   ;;  %v1444_v32 = vld [vmem:[%s2118_s0 + $0x90] ss:$8 sps:$4 sm:$0xff]  }
   0xb   :  { %623 = vmatpush1.bf16.msra.mxu0 %v1423_v5  ;;  %1336 = vmatprep.subr.bf16.mxu1 %v1654_v19  ;;  %v1442_v30 = vld [vmem:[%s2118_s0 + $0x94] ss:$8 sps:$4 sm:$0xff]   ;;  %v1717_v33 = vld [vmem:[%s2118_s0 + $0x150] ss:$8 sps:$4 sm:$0xff]   ;;  %v1445_v34 = vld [vmem:[%s2118_s0 + $0xa4] ss:$8 sps:$4 sm:$0xff]  }
   0xc   :  { %624 = vmatprep.subr.bf16.mxu0 %v1424_v6  ;;  %650 = vmatprep.mubr.bf16.mxu0 %v1479_v27  ;;  %v1708_v31 = vld [vmem:[%s2118_s0 + $0x154] ss:$8 sps:$4 sm:$0xff]   ;;  %v1726_v35 = vld [vmem:[%s2118_s0 + $0x164] ss:$8 sps:$4 sm:$0xff]   ;;  %v1447_v36 = vld [vmem:[%s2118_s0 + $0xa0] ss:$8 sps:$4 sm:$0xff]  }
   0xd   :  { %v1501_v37 = vld [vmem:[%s2119_s1 + $0x4c] ss:$16 sps:$4 sm:$0xff]   ;;  %v1741_v39 = vld [vmem:[%s2118_s0 + $0x160] ss:$8 sps:$4 sm:$0xff]   ;;  %v1450_v41 = vld [vmem:[%s2118_s0 + $0xb0] ss:$8 sps:$4 sm:$0xff]  }
   0xe   :  { %1345 = vmatpush1.bf16.msra.mxu1 %v1663_v21  ;;  %v1448_v38 = vld [vmem:[%s2118_s0 + $0xb4] ss:$8 sps:$4 sm:$0xff]   ;;  %1313 = vmatprep.mubr.msk.bf16.mxu1 %vm593_vm0, %v1501_v37  ;;  %v1454_v42 = vld [vmem:[%s2118_s0 + $0xc4] ss:$8 sps:$4 sm:$0xff]   ;;  %v1760_v43 = vld [vmem:[%s2118_s0 + $0x170] ss:$8 sps:$4 sm:$0xff]  }
   0xf   :  { %625 = vmatpush1.bf16.msra.mxu0 %v1426_v7  ;;  %1337 = vmatprep.subr.bf16.mxu1 %v1669_v22  ;;  %v1747_v40 = vld [vmem:[%s2118_s0 + $0x174] ss:$8 sps:$4 sm:$0xff]   ;;  %v1766_v44 = vld [vmem:[%s2118_s0 + $0x184] ss:$8 sps:$4 sm:$0xff]   ;;  %v1456_v45 = vld [vmem:[%s2118_s0 + $0xc0] ss:$8 sps:$4 sm:$0xff]  }
  0x10   :  { %626 = vmatprep.subr.bf16.mxu0 %v1427_v9  ;;  %v1775_v46 = vld [vmem:[%s2118_s0 + $0x180] ss:$8 sps:$4 sm:$0xff]   ;;  %v1460_v47 = vld [vmem:[%s2118_s0 + $0xd4] ss:$8 sps:$4 sm:$0xff]   ;;  %v1462_v48 = vld [vmem:[%s2118_s0 + $0xd0] ss:$8 sps:$4 sm:$0xff]  }
  0x11   :  { %v1499_v49 = vld [vmem:[%s2119_s1 + $0x48] ss:$16 sps:$4 sm:$0xff]   ;;  %v1505_v50 = vld [vmem:[%s2119_s1 + $0x6c] ss:$16 sps:$4 sm:$0xff]   ;;  %v107_v52 = vld [vmem:[%s2120_s2] sm:$0xff]  ;;  %vm1174_vm3 = vcmask 785408  }
  0x12   :  { %1346 = vmatpush1.bf16.msra.mxu1 %v1681_v25  ;;  %v1466_v51 = vld [vmem:[%s2118_s0 + $0xe4] ss:$8 sps:$4 sm:$0xff]   ;;  %124 = vperm.xlu0 %1413, %v107_v52   ;;  %v109_v53 = vld [vmem:[%s2120_s2 + $0x10] sm:$0xff]  ;;  %v1468_v55 = vld [vmem:[%s2118_s0 + $0xe0] ss:$8 sps:$4 sm:$0xff]  }
  0x13   :  { %627 = vmatpush1.bf16.msra.mxu0 %v1429_v10  ;;  %1338 = vmatprep.subr.bf16.mxu1 %v1687_v26  ;;  %v108_v54 = vld [vmem:[%s2120_s2 + $0x8] sm:$0xff]  ;;  %v110_v56 = vld [vmem:[%s2120_s2 + $0x18] sm:$0xff]  ;;  %v111_v59 = vld [vmem:[%s2120_s2 + $0x20] sm:$0xff] }
  0x14   :  { %628 = vmatprep.subr.bf16.mxu0 %v1430_v11  ;;  %134 = vperm.xlu1 %1414, %v109_v53   ;;  %v1472_v57 = vld [vmem:[%s2118_s0 + $0xf4] ss:$8 sps:$4 sm:$0xff]   ;;  %v1507_v58 = vld [vmem:[%s2119_s1 + $0x68] ss:$16 sps:$4 sm:$0xff]   ;;  %v1477_v63 = vld [vmem:[%s2119_s1] ss:$16 sps:$4 sm:$0xff]  }
  0x15   :  { %v1474_v60 = vld [vmem:[%s2118_s0 + $0xf0] ss:$8 sps:$4 sm:$0xff]   ;;  %v1511_v61 = vld [vmem:[%s2119_s1 + $0x8c] ss:$16 sps:$4 sm:$0xff]   ;;  %v1486_v1 = vld [vmem:[%s2119_s1 + $0x24] ss:$16 sps:$4 sm:$0xff]  }
  0x16   :  { %1347 = vmatpush1.bf16.msra.mxu1 %v1699_v29  ;;  %129 = vperm.xlu0 %1413, %v108_v54   ;;  %v112_v62 = vld [vmem:[%s2120_s2 + $0x28] sm:$0xff]  ;;  %v113_v0 = vld [vmem:[%s2120_s2 + $0x30] sm:$0xff]  ;;  %v114_v2 = vld [vmem:[%s2120_s2 + $0x38] sm:$0xff] }
  0x17   :  { %629 = vmatpush1.bf16.msra.mxu0 %v1432_v14  ;;  %1339 = vmatprep.subr.bf16.mxu1 %v1708_v31  ;;  %v1513_v3 = vld [vmem:[%s2119_s1 + $0x88] ss:$16 sps:$4 sm:$0xff]   ;;  %v115_v4 = vld [vmem:[%s2120_s2 + $0x40] sm:$0xff]  ;;  %v1517_v5 = vld [vmem:[%s2119_s1 + $0xac] ss:$16 sps:$4 sm:$0xff]  }
  0x18   :  { %630 = vmatprep.subr.bf16.mxu0 %v1433_v17  ;;  %139 = vperm.xlu1 %1414, %v110_v56   ;;  %v116_v6 = vld [vmem:[%s2120_s2 + $0x48] sm:$0xff]  ;;  %v1489_v7 = vld [vmem:[%s2119_s1 + $0x20] ss:$16 sps:$4 sm:$0xff]   ;;  %v1495_v10 = vld [vmem:[%s2119_s1 + $0x44] ss:$16 sps:$4 sm:$0xff]  }
  0x19   :  { %v117_v9 = vld [vmem:[%s2120_s2 + $0x50] sm:$0xff]  ;;  %v118_v11 = vld [vmem:[%s2120_s2 + $0x58] sm:$0xff] }
  0x1a   :  { %1348 = vmatpush1.bf16.msra.mxu1 %v1717_v33  ;;  %144 = vperm.xlu0 %1413, %v111_v59   ;;  %v1523_v14 = vld [vmem:[%s2119_s1 + $0xcc] ss:$16 sps:$4 sm:$0xff]   ;;  %v121_v17 = vld [vmem:[%s2120_s2 + $0x70] sm:$0xff] }
  0x1b   :  { %631 = vmatpush1.bf16.msra.mxu0 %v1435_v18  ;;  %1340 = vmatprep.subr.bf16.mxu1 %v1726_v35  ;;  %v1502_v18 = vld [vmem:[%s2119_s1 + $0x64] ss:$16 sps:$4 sm:$0xff]  }
  0x1c   :  { %632 = vmatprep.subr.bf16.mxu0 %v1436_v20  ;;  %149 = vperm.xlu1 %1414, %v112_v62   ;;  %v56_v20 = vld [vmem:[%s2119_s1 + $0xe8] sm:$0xff]  ;;  %v1508_v27 = vld [vmem:[%s2119_s1 + $0x84] ss:$16 sps:$4 sm:$0xff]  }
  0x1d   :  { %v908_v37 = vld [vmem:[%s2121_s4 + $0x50] sm:$0xff] }
  0x1e   :  { %1349 = vmatpush1.bf16.msra.mxu1 %v1741_v39  ;;  %154 = vperm.xlu0 %1413, %v113_v0  }
  0x1f   :  { %633 = vmatpush1.bf16.msra.mxu0 %v1438_v23  ;;  %1341 = vmatprep.subr.bf16.mxu1 %v1747_v40  ;;  %v1260_v23 = vcombine.high %v56_v20, %v56_v20 }
  0x20   :  { %634 = vmatprep.subr.bf16.mxu0 %v1439_v24  ;;  %159 = vperm.xlu1 %1414, %v114_v2   ;;  %v900_v24 = vld [vmem:[%s2121_s4 + $0x10] sm:$0xff] }
  0x22   :  { %1350 = vmatpush1.bf16.msra.mxu1 %v1760_v43  ;;  %164 = vperm.xlu0 %1413, %v115_v4  }
  0x23   :  { %635 = vmatpush1.bf16.msra.mxu0 %v1441_v28  ;;  %1342 = vmatprep.subr.bf16.mxu1 %v1766_v44  ;;  %v902_v28 = vld [vmem:[%s2121_s4 + $0x20] sm:$0xff] }
  0x24   :  { %636 = vmatprep.subr.bf16.mxu0 %v1442_v30  ;;  %169 = vperm.xlu1 %1414, %v116_v6   ;;  %v903_v30 = vld [vmem:[%s2121_s4 + $0x28] sm:$0xff] }
  0x26   :  { %1351 = vmatpush1.bf16.msra.mxu1 %v1775_v46  ;;  %174 = vperm.xlu0 %1413, %v117_v9  }
  0x27   :  { %637 = vmatpush1.bf16.msra.mxu0 %v1444_v32  ;;  %v1510_v32 = vld [vmem:[%s2119_s1 + $0x80] ss:$16 sps:$4 sm:$0xff]  }
  0x28   :  { %638 = vmatprep.subr.bf16.mxu0 %v1445_v34  ;;  %179 = vperm.xlu1 %1414, %v118_v11   ;;  %v1514_v34 = vld [vmem:[%s2119_s1 + $0xa4] ss:$16 sps:$4 sm:$0xff]  }
  0x29   :  { %782 = vmatmul.mubr.bf16.vlgmr.msra.gmra.mrb[0].mxu1 %v1499_v49  ;;  %v1533_v49 = vld [vmem:[%s2119_s1 + $0x2c] ss:$16 sps:$4 sm:$0xff]  }
  0x2a   :  { %1314 = vmatprep.mubr.msk.bf16.mxu1 %vm593_vm0, %v1505_v50  ;;  %v1535_v50 = vld [vmem:[%s2119_s1 + $0x28] ss:$16 sps:$4 sm:$0xff]  }
  0x2b   :  { %639 = vmatpush1.bf16.msra.mxu0 %v1447_v36  ;;  %v907_v36 = vld [vmem:[%s2121_s4 + $0x48] sm:$0xff] }
  0x2c   :  { %640 = vmatprep.subr.bf16.mxu0 %v1448_v38  ;;  %v1516_v38 = vld [vmem:[%s2119_s1 + $0xa0] ss:$16 sps:$4 sm:$0xff]  }
  0x2f   :  { %641 = vmatpush1.bf16.msra.mxu0 %v1450_v41  ;;  %v1157_v41 = vld [vmem:[%s2122_s6] sm:$0xff] }
  0x30   :  { %642 = vmatprep.subr.bf16.mxu0 %v1454_v42  ;;  %v1158_v42 = vld [vmem:[%s2122_s6 + $0x8] sm:$0xff] }
  0x31   :  { %792 = vmatmul.mubr.bf16.gmra.mrb[4].mxu1 %v1507_v58 }
  0x32   :  { %1315 = vmatprep.mubr.msk.bf16.mxu1 %vm593_vm0, %v1511_v61 }
  0x33   :  { %643 = vmatpush1.bf16.msra.mxu0 %v1456_v45 }
  0x34   :  { %644 = vmatprep.subr.bf16.mxu0 %v1460_v47  ;;  %v1532_v47 = vld [vmem:[%s2119_s1 + $0xc] ss:$16 sps:$4 sm:$0xff]  }
  0x37   :  { %645 = vmatpush1.bf16.msra.mxu0 %v1462_v48  ;;  %v1530_v48 = vld [vmem:[%s2119_s1 + $0x8] ss:$16 sps:$4 sm:$0xff]  }
  0x38   :  { %646 = vmatprep.subr.bf16.mxu0 %v1466_v51 }
  0x39   :  { %802 = vmatmul.mubr.bf16.gmra.mrb[8].mxu1 %v1513_v3 }
  0x3a   :  { %1316 = vmatprep.mubr.msk.bf16.mxu1 %vm593_vm0, %v1517_v5 }
  0x3b   :  { %647 = vmatpush1.bf16.msra.mxu0 %v1468_v55 }
  0x3c   :  { %648 = vmatprep.subr.bf16.mxu0 %v1472_v57 }
  0x3f   :  { %649 = vmatpush1.bf16.msra.mxu0 %v1474_v60 }
  0x40   :  { %729 = vmatprep.subr.bf16.mxu0 %v1622_v12  ;;  %v1519_v12 = vld [vmem:[%s2119_s1 + $0xa8] ss:$16 sps:$4 sm:$0xff]  }
  0x41   :  { %812 = vmatmul.mubr.bf16.gmra.mrb[12].mxu1 %v1519_v12 }
  0x42   :  { %651 = vmatmul.mubr.bf16.vlgmr.msra.gmra.mrb[0].mxu0 %v1477_v63  ;;  %1317 = vmatprep.mubr.msk.bf16.mxu1 %vm593_vm0, %v1523_v14 }
  0x43   :  { %660 = vmatprep.mubr.bf16.mxu0 %v1486_v1  ;;  %730 = vmatpush1.bf16.msra.mxu0 %v1627_v13  ;;  %v119_v13 = vld [vmem:[%s2120_s2 + $0x60] sm:$0xff] }
  0x44   :  { %731 = vmatprep.subr.bf16.mxu0 %v1637_v15  ;;  %v120_v15 = vld [vmem:[%s2120_s2 + $0x68] sm:$0xff]  ;;  %184 = vperm.xlu0 %1413, %v119_v13  }
  0x45   :  { %189 = vperm.xlu1 %1414, %v120_v15  }
  0x47   :  { %732 = vmatpush1.bf16.msra.mxu0 %v1642_v16  ;;  %v1498_v16 = vld [vmem:[%s2119_s1 + $0x40] ss:$16 sps:$4 sm:$0xff]  }
  0x48   :  { %733 = vmatprep.subr.bf16.mxu0 %v1654_v19  ;;  %v898_v19 = vld [vmem:[%s2121_s4] sm:$0xff]  ;;  %194 = vperm.xlu0 %1413, %v121_v17  }
  0x49   :  { %912 = vperm.xlu1 %1414, %v898_v19  }
  0x4a   :  { %661 = vmatmul.mubr.bf16.gmra.mrb[4].mxu0 %v1489_v7 }
  0x4b   :  { %670 = vmatprep.mubr.bf16.mxu0 %v1495_v10  ;;  %734 = vmatpush1.bf16.msra.mxu0 %v1663_v21  ;;  %v1525_v21 = vld [vmem:[%s2119_s1 + $0xc8] ss:$16 sps:$4 sm:$0xff]  }
  0x4c   :  { %735 = vmatprep.subr.bf16.mxu0 %v1669_v22  ;;  %v899_v22 = vld [vmem:[%s2121_s4 + $0x8] sm:$0xff]  ;;  %822 = vmatmul.mubr.bf16.gmra.mrb[16].mxu1 %v1525_v21 }
  0x4d   :  { %917 = vperm.xlu0 %1413, %v899_v22   ;;  %922 = vperm.xlu1 %1414, %v900_v24  }
  0x4e   :  { %1318 = vmatprep.mubr.msk.bf16.mxu1 %vm593_vm0, %v1260_v23 }
  0x4f   :  { %736 = vmatpush1.bf16.msra.mxu0 %v1681_v25  ;;  %v1504_v25 = vld [vmem:[%s2119_s1 + $0x60] ss:$16 sps:$4 sm:$0xff]  }
  0x50   :  { %737 = vmatprep.subr.bf16.mxu0 %v1687_v26  ;;  %v901_v26 = vld [vmem:[%s2121_s4 + $0x18] sm:$0xff] }
  0x51   :  { %927 = vperm.xlu0 %1413, %v901_v26   ;;  %932 = vperm.xlu1 %1414, %v902_v28  }
  0x52   :  { %671 = vmatmul.mubr.bf16.gmra.mrb[8].mxu0 %v1498_v16 }
  0x53   :  { %680 = vmatprep.mubr.bf16.mxu0 %v1502_v18  ;;  %738 = vmatpush1.bf16.msra.mxu0 %v1699_v29  ;;  %v1259_v29 = vcombine.low %v56_v20, %v56_v20 }
  0x54   :  { %739 = vmatprep.subr.bf16.mxu0 %v1708_v31  ;;  %v904_v31 = vld [vmem:[%s2121_s4 + $0x30] sm:$0xff] }
  0x55   :  { %937 = vperm.xlu0 %1413, %v903_v30   ;;  %832 = vmatmul.mubr.bf16.gmra.mrb[20].mxu1 %v1259_v29 }
  0x56   :  { %942 = vperm.xlu1 %1414, %v904_v31   ;;  %1058 = vmatprep.mubr.bf16.mxu1 %v1543_v8 }
  0x57   :  { %740 = vmatpush1.bf16.msra.mxu0 %v1717_v33  ;;  %v905_v33 = vld [vmem:[%s2121_s4 + $0x38] sm:$0xff] }
  0x58   :  { %741 = vmatprep.subr.bf16.mxu0 %v1726_v35  ;;  %v906_v35 = vld [vmem:[%s2121_s4 + $0x40] sm:$0xff] }
  0x59   :  { %947 = vperm.xlu0 %1413, %v905_v33  }
  0x5a   :  { %681 = vmatmul.mubr.bf16.gmra.mrb[12].mxu0 %v1504_v25  ;;  %952 = vperm.xlu1 %1414, %v906_v35  }
  0x5b   :  { %690 = vmatprep.mubr.bf16.mxu0 %v1508_v27  ;;  %742 = vmatpush1.bf16.msra.mxu0 %v1741_v39  ;;  %v909_v39 = vld [vmem:[%s2121_s4 + $0x58] sm:$0xff] }
  0x5c   :  { %743 = vmatprep.subr.bf16.mxu0 %v1747_v40  ;;  %v1520_v40 = vld [vmem:[%s2119_s1 + $0xc4] ss:$16 sps:$4 sm:$0xff]  }
  0x5d   :  { %957 = vperm.xlu0 %1413, %v907_v36  }
  0x5e   :  { %962 = vperm.xlu1 %1414, %v908_v37  }
  0x5f   :  { %744 = vmatpush1.bf16.msra.mxu0 %v1760_v43  ;;  %v55_v43 = vld [vmem:[%s2119_s1 + $0xe0] sm:$0xff] }
  0x60   :  { %745 = vmatprep.subr.bf16.mxu0 %v1766_v44  ;;  %v1522_v44 = vld [vmem:[%s2119_s1 + $0xc0] ss:$16 sps:$4 sm:$0xff]   ;;  %v1258_v45 = vcombine.high %v55_v43, %v55_v43 }
  0x61   :  { %967 = vperm.xlu0 %1413, %v909_v39  }
  0x62   :  { %691 = vmatmul.mubr.bf16.gmra.mrb[16].mxu0 %v1510_v32  ;;  %1161 = vperm.xlu1 %1414, %v1157_v41  }
  0x63   :  { %700 = vmatprep.mubr.bf16.mxu0 %v1514_v34  ;;  %746 = vmatpush1.bf16.msra.mxu0 %v1775_v46  ;;  %v1257_v46 = vcombine.low %v55_v43, %v55_v43 }
  0x65   :  { %1166 = vperm.xlu0 %1413, %v1158_v42  }
  0x6a   :  { %701 = vmatmul.mubr.bf16.gmra.mrb[20].mxu0 %v1516_v38 }
  0x6b   :  { %710 = vmatprep.mubr.bf16.mxu0 %v1520_v40 }
  0x72   :  { %711 = vmatmul.mubr.bf16.gmra.mrb[24].mxu0 %v1522_v44 }
  0x73   :  { %720 = vmatprep.mubr.bf16.mxu0 %v1258_v45 }
  0x7a   :  { %721 = vmatmul.mubr.bf16.gmra.mrb[28].mxu0 %v1257_v46 }
  0x7b   :  { %1311 = vmatprep.mubr.msk.bf16.mxu0 %vm593_vm0, %v1532_v47 }
  0x82   :  { %762 = vmatmul.mubr.bf16.vlgmr.msra.gmra.mrb[0].mxu0 %v1530_v48 }
  0x83   :  { %1312 = vmatprep.mubr.msk.bf16.mxu0 %vm593_vm0, %v1533_v49 }
  0x8a   :  { %772 = vmatmul.mubr.bf16.gmra.mrb[4].mxu0 %v1535_v50 }
  0x91   :  { %v1994_v59 = vpop.permute.xlu0 %124 }
  0x93   :  { %v1996_v60 = vpop.permute.xlu1 %134 }
  0x95   :  { %v2006_v1 = vpop.permute.xlu0 %129 }
  0x97   :  { %v2008_v2 = vpop.permute.xlu1 %139 }
  0x99   :  { %v145_v5 = vpop.permute.xlu0 %144 }
  0x9b   :  { %v150_v10 = vpop.permute.xlu1 %149 }
  0x9d   :  { %v155_v23 = vpop.permute.xlu0 %154 }
  0x9f   :  { %v160_v32 = vpop.permute.xlu1 %159 }
  0xa1   :  { %v165_v49 = vpop.permute.xlu0 %164 }
  0xfc   :  { %v783_v51 = vpop.f32.mrb[0].mxu1 }
  0xfd   :  { %v785_v52 = vpop.f32.mrb[1].mxu1 }
  0xfe   :  { %v787_v53 = vpop.f32.mrb[2].mxu1 }
  0xff   :  { %v789_v54 = vpop.f32.mrb[3].mxu1 }
 0x104   :  { %v793_v55 = vpop.f32.mrb[4].mxu1 }
 0x105   :  { %v795_v56 = vpop.f32.mrb[5].mxu1 }
 0x106   :  { %v797_v57 = vpop.f32.mrb[6].mxu1 }
 0x107   :  { %v799_v58 = vpop.f32.mrb[7].mxu1 }
 0x10c   :  { %v1998_v61 = vpop.f32.mrb[8].mxu1 }
 0x10d   :  { %v2000_v62 = vpop.f32.mrb[9].mxu1 }
 0x10e   :  { %v2002_v63 = vpop.f32.mrb[10].mxu1 }
 0x10f   :  { %v2004_v0 = vpop.f32.mrb[11].mxu1 }
 0x114   :  { %v2010_v3 = vpop.f32.mrb[12].mxu1 }
 0x115   :  { %v2012_v4 = vpop.f32.mrb[13].mxu1 }
 0x116   :  { %v2014_v6 = vpop.f32.mrb[14].mxu1 }
 0x117   :  { %v2016_v7 = vpop.f32.mrb[15].mxu1 }
 0x11f   :  { %v2018_v20 = vpop.f32.mrb[16].mxu1 }
 0x120   :  { %v2020_v22 = vpop.f32.mrb[17].mxu1 }
 0x121   :  { %v2022_v25 = vpop.f32.mrb[18].mxu1 }
 0x122   :  { %v2024_v28 = vpop.f32.mrb[19].mxu1 }
 0x125   :  { %v672_v9 = vpop.f32.mrb[8].mxu0 }
 0x126   :  { %v673_v11 = vadd.f32 %v672_v9, %v145_v5  ;;  %v674_v12 = vpop.f32.mrb[9].mxu0  ;;  %v170_v9 = vpop.permute.xlu1 %169 }
 0x127   :  { %v675_v13 = vadd.f32 %v674_v12, %v145_v5  ;;  %v676_v14 = vpop.f32.mrb[10].mxu0 }
 0x128   :  { %v677_v15 = vadd.f32 %v676_v14, %v150_v10  ;;  %v784_v16 = vadd.f32 %v783_v51, %v673_v11  ;;  %v678_v17 = vpop.f32.mrb[11].mxu0  ;;  %v2030_v44 = vpop.f32.mrb[20].mxu1 }
 0x129   :  { %v679_v18 = vadd.f32 %v678_v17, %v150_v10  ;;  %v786_v19 = vadd.f32 %v785_v52, %v675_v13  ;;  %v2032_v46 = vpop.f32.mrb[21].mxu1 }
 0x12a   :  { %v788_v21 = vadd.f32 %v787_v53, %v677_v15  ;;  %v848_v26 = vmax.f32 %v784_v16, 0.0  ;;  %v837_v48 = vpop.f32.mrb[22].mxu1 }
 0x12b   :  { %v790_v24 = vadd.f32 %v789_v54, %v679_v18  ;;  %v849_v29 = vmax.f32 %v786_v19, 0.0  ;;  %v838_v52 = vpop.f32.mrb[23].mxu1 }
 0x12c   :  { %v850_v27 = vmax.f32 %v788_v21, 0.0 }
 0x12d   :  { %v851_v30 = vmax.f32 %v790_v24, 0.0  ;;  %v682_v31 = vpop.f32.mrb[12].mxu0 }
 0x12e   :  { %v2026_v33 = vpack.c.bf16 %v850_v27, %v848_v26  ;;  %v683_v34 = vadd.f32 %v682_v31, %v155_v23  ;;  %v684_v35 = vpop.f32.mrb[13].mxu0 }
 0x12f   :  { %v2028_v36 = vpack.c.bf16 %v851_v30, %v849_v29  ;;  %v685_v37 = vadd.f32 %v684_v35, %v155_v23  ;;  %v686_v38 = vpop.f32.mrb[14].mxu0  ;;  %v175_v23 = vpop.permute.xlu0 %174 }
 0x130   :  { %v687_v39 = vadd.f32 %v686_v38, %v160_v32  ;;  %v794_v40 = vadd.f32 %v793_v55, %v683_v34  ;;  %v688_v41 = vpop.f32.mrb[15].mxu0 }
 0x131   :  { %v689_v42 = vadd.f32 %v688_v41, %v160_v32  ;;  %v796_v43 = vadd.f32 %v795_v56, %v685_v37 }
 0x132   :  { %v798_v45 = vadd.f32 %v797_v57, %v687_v39  ;;  %v852_v50 = vmax.f32 %v794_v40, 0.0 }
 0x133   :  { %v800_v47 = vadd.f32 %v799_v58, %v689_v42  ;;  %v853_v53 = vmax.f32 %v796_v43, 0.0  ;;  %v185_v43 = vpop.permute.xlu0 %184 }
 0x134   :  { %v854_v51 = vmax.f32 %v798_v45, 0.0 }
 0x135   :  { %v855_v54 = vmax.f32 %v800_v47, 0.0  ;;  %v692_v5 = vpop.f32.mrb[16].mxu0 }
 0x136   :  { %v2034_v10 = vpack.c.bf16 %v854_v51, %v852_v50  ;;  %v693_v55 = vadd.f32 %v692_v5, %v165_v49  ;;  %v694_v11 = vpop.f32.mrb[17].mxu0 }
 0x137   :  { %v2036_v56 = vpack.c.bf16 %v855_v54, %v853_v53  ;;  %v695_v12 = vadd.f32 %v694_v11, %v165_v49  ;;  %v696_v57 = vpop.f32.mrb[18].mxu0 }
 0x138   :  { %v697_v13 = vadd.f32 %v696_v57, %v170_v9  ;;  %v804_v58 = vadd.f32 %v1998_v61, %v693_v55  ;;  %v698_v14 = vpop.f32.mrb[19].mxu0  ;;  %v180_v61 = vpop.permute.xlu1 %179 }
 0x139   :  { %v699_v15 = vadd.f32 %v698_v14, %v170_v9  ;;  %v806_v16 = vadd.f32 %v2000_v62, %v695_v12 }
 0x13a   :  { %v808_v17 = vadd.f32 %v2002_v63, %v697_v13  ;;  %v856_v19 = vmax.f32 %v804_v58, 0.0  ;;  %v195_v13 = vpop.permute.xlu0 %194 }
 0x13b   :  { %v810_v18 = vadd.f32 %v2004_v0, %v699_v15  ;;  %v857_v24 = vmax.f32 %v806_v16, 0.0 }
 0x13c   :  { %v858_v21 = vmax.f32 %v808_v17, 0.0  ;;  %v190_v52 = vpop.permute.xlu1 %189 }
 0x13d   :  { %v859_v26 = vmax.f32 %v810_v18, 0.0  ;;  %v702_v27 = vpop.f32.mrb[20].mxu0 }
 0x13e   :  { %v2042_v29 = vpack.c.bf16 %v858_v21, %v856_v19  ;;  %v703_v30 = vadd.f32 %v702_v27, %v175_v23  ;;  %v704_v31 = vpop.f32.mrb[21].mxu0 }
 0x13f   :  { %v2044_v32 = vpack.c.bf16 %v859_v26, %v857_v24  ;;  %v705_v34 = vadd.f32 %v704_v31, %v175_v23  ;;  %v706_v35 = vpop.f32.mrb[22].mxu0 }
 0x140   :  { %v707_v62 = vadd.f32 %v706_v35, %v180_v61  ;;  %v814_v63 = vadd.f32 %v2010_v3, %v703_v30  ;;  %v708_v37 = vpop.f32.mrb[23].mxu0 }
 0x141   :  { %v709_v0 = vadd.f32 %v708_v37, %v180_v61  ;;  %v816_v38 = vadd.f32 %v2012_v4, %v705_v34 }
 0x142   :  { %v818_v39 = vadd.f32 %v2014_v6, %v707_v62  ;;  %v860_v41 = vmax.f32 %v814_v63, 0.0 }
 0x143   :  { %v820_v40 = vadd.f32 %v2016_v7, %v709_v0  ;;  %v861_v45 = vmax.f32 %v816_v38, 0.0 }
 0x144   :  { %v862_v42 = vmax.f32 %v818_v39, 0.0 }
 0x145   :  { %v863_v47 = vmax.f32 %v820_v40, 0.0  ;;  %v712_v48 = vpop.f32.mrb[24].mxu0 }
 0x146   :  { %v2050_v49 = vpack.c.bf16 %v862_v42, %v860_v41  ;;  %v713_v50 = vadd.f32 %v712_v48, %v185_v43  ;;  %v714_v51 = vpop.f32.mrb[25].mxu0 }
 0x147   :  { %v893_v3 = vpack.c.bf16 %v863_v47, %v861_v45  ;;  %v715_v53 = vadd.f32 %v714_v51, %v185_v43  ;;  %v716_v54 = vpop.f32.mrb[26].mxu0 }
 0x148   :  { %v717_v5 = vadd.f32 %v716_v54, %v190_v52  ;;  %v824_v4 = vadd.f32 %v2018_v20, %v713_v50  ;;  %v718_v6 = vpop.f32.mrb[27].mxu0 }
 0x149   :  { %v719_v9 = vadd.f32 %v718_v6, %v190_v52  ;;  %v826_v7 = vadd.f32 %v2020_v22, %v715_v53  ;;  %v918_v6 = vpop.permute.xlu0 %917 }
 0x14a   :  { %v828_v55 = vadd.f32 %v2022_v25, %v717_v5  ;;  %v864_v12 = vmax.f32 %v824_v4, 0.0 }
 0x14b   :  { %v830_v11 = vadd.f32 %v2024_v28, %v719_v9  ;;  %v865_v58 = vmax.f32 %v826_v7, 0.0 }
 0x14c   :  { %v866_v57 = vmax.f32 %v828_v55, 0.0 }
 0x14d   :  { %v867_v14 = vmax.f32 %v830_v11, 0.0  ;;  %v722_v15 = vpop.f32.mrb[28].mxu0 }
 0x14e   :  { %v894_v16 = vpack.c.bf16 %v866_v57, %v864_v12  ;;  %v723_v17 = vadd.f32 %v722_v15, %v195_v13  ;;  %v724_v18 = vpop.f32.mrb[29].mxu0 }
 0x14f   :  { %v895_v19 = vpack.c.bf16 %v867_v14, %v865_v58  ;;  %v725_v21 = vadd.f32 %v724_v18, %v195_v13  ;;  %v726_v20 = vpop.f32.mrb[30].mxu0 }
 0x150   :  { %v834_v23 = vadd.f32 %v2030_v44, %v723_v17  ;;  %v727_v24 = vpop.f32.mrb[31].mxu0 }
 0x151   :  { %v836_v22 = vadd.f32 %v2032_v46, %v725_v21  ;;  %v928_v21 = vpop.permute.xlu0 %927 }
 0x155   :  { %v763_v25 = vpop.f32.mrb[0].mxu0 }
 0x156   :  { %v1352_v28 = vadd.f32 %v763_v25, %v1994_v59  ;;  %v765_v26 = vpop.f32.mrb[1].mxu0 }
 0x157   :  { %v1353_v27 = vadd.f32 %v765_v26, %v1994_v59  ;;  %v767_v30 = vpop.f32.mrb[2].mxu0 }
 0x158   :  { %v1354_v31 = vadd.f32 %v767_v30, %v2006_v1  ;;  %v769_v61 = vpop.f32.mrb[3].mxu0  ;;  %v840_v35 = vmax.f32 %v1352_v28, 0.0 }
 0x159   :  { %v1355_v34 = vadd.f32 %v769_v61, %v2006_v1  ;;  %v841_v63 = vmax.f32 %v1353_v27, 0.0 }
 0x15a   :  { %v842_v62 = vmax.f32 %v1354_v31, 0.0 }
 0x15b   :  { %v843_v37 = vmax.f32 %v1355_v34, 0.0 }
 0x15c   :  { %v882_v44 = vpack.c.bf16 %v842_v62, %v840_v35 }
 0x15d   :  { %v883_v0 = vpack.c.bf16 %v843_v37, %v841_v63  ;;  %v773_v38 = vpop.f32.mrb[4].mxu0  ;;  %v938_v37 = vpop.permute.xlu0 %937 }
 0x15e   :  { %v1356_v46 = vadd.f32 %v773_v38, %v1996_v60  ;;  %v775_v39 = vpop.f32.mrb[5].mxu0 }
 0x15f   :  { %v1357_v40 = vadd.f32 %v775_v39, %v1996_v60  ;;  %v777_v41 = vpop.f32.mrb[6].mxu0  ;;  %1026 = vmatprep.subr.bf16.mxu1 %v883_v0  ;;  %v868_v60 = vmax.f32 %v834_v23, 0.0 }
 0x160   :  { %v1358_v59 = vadd.f32 %v777_v41, %v2008_v2  ;;  %v779_v42 = vpop.f32.mrb[7].mxu0  ;;  %1027 = vmatpush1.bf16.msra.mxu1 %v882_v44  ;;  %v844_v43 = vmax.f32 %v1356_v46, 0.0 }
 0x161   :  { %v1359_v1 = vadd.f32 %v779_v42, %v2008_v2  ;;  %v845_v47 = vmax.f32 %v1357_v40, 0.0  ;;  %v869_v2 = vmax.f32 %v836_v22, 0.0  ;;  %v896_v52 = vpack.c.bf16 %v868_v60, %v868_v60 }
 0x162   :  { %v846_v45 = vmax.f32 %v1358_v59, 0.0 }
 0x163   :  { %v847_v48 = vmax.f32 %v1359_v1, 0.0  ;;  %v897_v53 = vpack.c.bf16 %v869_v2, %v869_v2 }
 0x164   :  { %v884_v50 = vpack.c.bf16 %v846_v45, %v844_v43 }
 0x165   :  { %v885_v51 = vpack.c.bf16 %v847_v48, %v845_v47 }
 0x167   :  { %1028 = vmatprep.subr.bf16.mxu1 %v885_v51  ;;  %v948_v51 = vpop.permute.xlu0 %947 }
 0x168   :  { %1029 = vmatpush1.bf16.msra.mxu1 %v884_v50 }
 0x169   :  { %1030 = vmatprep.subr.bf16.mxu1 %v2028_v36  ;;  %v1536_v36 = vld [vmem:[%s2123_s3] sm:$0xff]  }
 0x16c   :  { %1031 = vmatpush1.bf16.msra.mxu1 %v2026_v33  ;;  %v1021_v33 = vsel %vm1019_vm1, %v896_v52, 0 }
 0x16d   :  { %1032 = vmatprep.subr.bf16.mxu1 %v2036_v56  ;;  %v1538_v56 = vld [vmem:[%s2123_s3 + $0x10] sm:$0xff]  }
 0x170   :  { %1033 = vmatpush1.bf16.msra.mxu1 %v2034_v10  ;;  %v1537_v10 = vld [vmem:[%s2123_s3 + $0x8] sm:$0xff]  }
 0x171   :  { %1034 = vmatprep.subr.bf16.mxu1 %v2044_v32  ;;  %v1540_v32 = vld [vmem:[%s2123_s3 + $0x20] sm:$0xff]  }
 0x174   :  { %1035 = vmatpush1.bf16.msra.mxu1 %v2042_v29  ;;  %v1539_v29 = vld [vmem:[%s2123_s3 + $0x18] sm:$0xff]  }
 0x175   :  { %1036 = vmatprep.subr.bf16.mxu1 %v893_v3  ;;  %v913_v3 = vpop.permute.xlu1 %912 }
 0x178   :  { %1037 = vmatpush1.bf16.msra.mxu1 %v2050_v49  ;;  %v1541_v49 = vld [vmem:[%s2123_s3 + $0x28] sm:$0xff]  }
 0x179   :  { %1038 = vmatprep.subr.bf16.mxu1 %v895_v19 }
 0x17c   :  { %1039 = vmatpush1.bf16.msra.mxu1 %v894_v16  ;;  %v923_v16 = vpop.permute.xlu1 %922 }
 0x17d   :  { %1325 = vmatprep.subr.msk.bf16.mxu1 %vm1019_vm1, %v897_v53 }
 0x180   :  { %1041 = vmatpush1.bf16.msra.mxu1 %v1021_v33  ;;  %v933_v61 = vpop.permute.xlu1 %932 }
 0x183   :  { %1326 = vmatmul.mubr.msk.bf16.vlgmr.msra.gmra.mrb[24].mxu1 %vm1000_vm2, %v1536_v36 }
 0x184   :  { %1068 = vmatprep.mubr.bf16.mxu1 %v1543_v8  ;;  %v943_v43 = vpop.permute.xlu1 %942 }
 0x18b   :  { %1327 = vmatmul.mubr.msk.bf16.gmra.mrb[28].mxu1 %vm1000_vm2, %v1537_v10 }
 0x18c   :  { %1078 = vmatprep.mubr.bf16.mxu1 %v1543_v8 }
 0x193   :  { %1328 = vmatmul.mubr.msk.bf16.gmra.mrb[32].mxu1 %vm1000_vm2, %v1538_v56 }
 0x194   :  { %1088 = vmatprep.mubr.bf16.mxu1 %v1543_v8 }
 0x19b   :  { %1329 = vmatmul.mubr.msk.bf16.gmra.mrb[36].mxu1 %vm1000_vm2, %v1539_v29 }
 0x19c   :  { %1098 = vmatprep.mubr.bf16.mxu1 %v1543_v8 }
 0x1a3   :  { %1330 = vmatmul.mubr.msk.bf16.gmra.mrb[40].mxu1 %vm1000_vm2, %v1540_v32 }
 0x1a4   :  { %1108 = vmatprep.mubr.bf16.mxu1 %v1543_v8 }
 0x1ab   :  { %1331 = vmatmul.mubr.msk.bf16.gmra.mrb[44].mxu1 %vm1000_vm2, %v1541_v49  ;;  %v953_v49 = vpop.permute.xlu1 %952 }
 0x1ac   :  { %1210 = vmatprep.mubr.bf16.mxu1 %v1543_v8 }
 0x256   :  { %v1060_v54 = vpop.f32.mrb[24].mxu1 }
 0x257   :  { %v1061_v5 = vadd.f32 %v1060_v54, %v913_v3  ;;  %v1062_v4 = vpop.f32.mrb[25].mxu1 }
 0x258   :  { %v1063_v9 = vadd.f32 %v1062_v4, %v913_v3  ;;  %v1064_v7 = vpop.f32.mrb[26].mxu1 }
 0x259   :  { %v1065_v55 = vadd.f32 %v1064_v7, %v918_v6  ;;  %v1066_v11 = vpop.f32.mrb[27].mxu1  ;;  %v1119_v57 = vmax.f32 %v1061_v5, 0.0 }
 0x25a   :  { %v1067_v12 = vadd.f32 %v1066_v11, %v918_v6  ;;  %v1120_v58 = vmax.f32 %v1063_v9, 0.0  ;;  %v958_v6 = vpop.permute.xlu0 %957 }
 0x25b   :  { %v1121_v13 = vmax.f32 %v1065_v55, 0.0 }
 0x25c   :  { %v1122_v14 = vmax.f32 %v1067_v12, 0.0 }
 0x25d   :  { %v1145_v15 = vpack.c.bf16 %v1121_v13, %v1119_v57 }
 0x25e   :  { %v1146_v17 = vpack.c.bf16 %v1122_v14, %v1120_v58  ;;  %v1070_v18 = vpop.f32.mrb[28].mxu1 }
 0x25f   :  { %v1071_v19 = vadd.f32 %v1070_v18, %v923_v16  ;;  %v1072_v8 = vpop.f32.mrb[29].mxu1 }
 0x260   :  { %v1073_v20 = vadd.f32 %v1072_v8, %v923_v16  ;;  %v1074_v23 = vpop.f32.mrb[30].mxu1  ;;  %1178 = vmatprep.subr.bf16.mxu1 %v1146_v17  ;;  %v963_v16 = vpop.permute.xlu1 %962 }
 0x261   :  { %v1075_v24 = vadd.f32 %v1074_v23, %v928_v21  ;;  %v1076_v22 = vpop.f32.mrb[31].mxu1  ;;  %1179 = vmatpush1.bf16.msra.mxu1 %v1145_v15  ;;  %v1123_v28 = vmax.f32 %v1071_v19, 0.0 }
 0x262   :  { %v1077_v25 = vadd.f32 %v1076_v22, %v928_v21  ;;  %v1124_v27 = vmax.f32 %v1073_v20, 0.0  ;;  %v968_v21 = vpop.permute.xlu0 %967 }
 0x263   :  { %v1125_v26 = vmax.f32 %v1075_v24, 0.0 }
 0x264   :  { %v1126_v30 = vmax.f32 %v1077_v25, 0.0 }
 0x265   :  { %v1147_v31 = vpack.c.bf16 %v1125_v26, %v1123_v28 }
 0x266   :  { %v1148_v34 = vpack.c.bf16 %v1126_v30, %v1124_v27  ;;  %v1080_v35 = vpop.f32.mrb[32].mxu1 }
 0x267   :  { %v1081_v62 = vadd.f32 %v1080_v35, %v933_v61  ;;  %v1082_v63 = vpop.f32.mrb[33].mxu1  ;;  %v1162_v35 = vpop.permute.xlu1 %1161 }
 0x268   :  { %v1083_v44 = vadd.f32 %v1082_v63, %v933_v61  ;;  %v1084_v0 = vpop.f32.mrb[34].mxu1  ;;  %1180 = vmatprep.subr.bf16.mxu1 %v1148_v34  ;;  %v1542_v34 = vld [vmem:[%s2124_s5] sm:$0xff]  }
 0x269   :  { %v1085_v38 = vadd.f32 %v1084_v0, %v938_v37  ;;  %v1086_v46 = vpop.f32.mrb[35].mxu1  ;;  %1181 = vmatpush1.bf16.msra.mxu1 %v1147_v31  ;;  %v1127_v40 = vmax.f32 %v1081_v62, 0.0 }
 0x26a   :  { %v1087_v39 = vadd.f32 %v1086_v46, %v938_v37  ;;  %v1128_v59 = vmax.f32 %v1083_v44, 0.0  ;;  %v1167_v44 = vpop.permute.xlu0 %1166 }
 0x26b   :  { %v1129_v41 = vmax.f32 %v1085_v38, 0.0 }
 0x26c   :  { %v1130_v42 = vmax.f32 %v1087_v39, 0.0 }
 0x26d   :  { %v1149_v1 = vpack.c.bf16 %v1129_v41, %v1127_v40 }
 0x26e   :  { %v1150_v45 = vpack.c.bf16 %v1130_v42, %v1128_v59  ;;  %v1090_v47 = vpop.f32.mrb[36].mxu1 }
 0x26f   :  { %v1091_v48 = vadd.f32 %v1090_v47, %v943_v43  ;;  %v1092_v50 = vpop.f32.mrb[37].mxu1 }
 0x270   :  { %v1093_v60 = vadd.f32 %v1092_v50, %v943_v43  ;;  %v1094_v2 = vpop.f32.mrb[38].mxu1  ;;  %1182 = vmatprep.subr.bf16.mxu1 %v1150_v45 }
 0x271   :  { %v1095_v52 = vadd.f32 %v1094_v2, %v948_v51  ;;  %v1096_v53 = vpop.f32.mrb[39].mxu1  ;;  %1183 = vmatpush1.bf16.msra.mxu1 %v1149_v1  ;;  %v1131_v36 = vmax.f32 %v1091_v48, 0.0 }
 0x272   :  { %v1097_v33 = vadd.f32 %v1096_v53, %v948_v51  ;;  %v1132_v56 = vmax.f32 %v1093_v60, 0.0 }
 0x273   :  { %v1133_v10 = vmax.f32 %v1095_v52, 0.0 }
 0x274   :  { %v1134_v29 = vmax.f32 %v1097_v33, 0.0 }
 0x275   :  { %v1151_v32 = vpack.c.bf16 %v1133_v10, %v1131_v36 }
 0x276   :  { %v1152_v3 = vpack.c.bf16 %v1134_v29, %v1132_v56  ;;  %v1100_v54 = vpop.f32.mrb[40].mxu1 }
 0x277   :  { %v1101_v5 = vadd.f32 %v1100_v54, %v953_v49  ;;  %v1102_v4 = vpop.f32.mrb[41].mxu1 }
 0x278   :  { %v1103_v9 = vadd.f32 %v1102_v4, %v953_v49  ;;  %v1104_v7 = vpop.f32.mrb[42].mxu1  ;;  %1184 = vmatprep.subr.bf16.mxu1 %v1152_v3 }
 0x279   :  { %v1105_v55 = vadd.f32 %v1104_v7, %v958_v6  ;;  %v1106_v11 = vpop.f32.mrb[43].mxu1  ;;  %1185 = vmatpush1.bf16.msra.mxu1 %v1151_v32  ;;  %v1135_v57 = vmax.f32 %v1101_v5, 0.0 }
 0x27a   :  { %v1107_v12 = vadd.f32 %v1106_v11, %v958_v6  ;;  %v1136_v58 = vmax.f32 %v1103_v9, 0.0 }
 0x27b   :  { %v1137_v13 = vmax.f32 %v1105_v55, 0.0 }
 0x27c   :  { %v1138_v14 = vmax.f32 %v1107_v12, 0.0 }
 0x27d   :  { %v1153_v15 = vpack.c.bf16 %v1137_v13, %v1135_v57 }
 0x27e   :  { %v1154_v17 = vpack.c.bf16 %v1138_v14, %v1136_v58  ;;  %v1110_v18 = vpop.f32.mrb[44].mxu1 }
 0x27f   :  { %v1111_v19 = vadd.f32 %v1110_v18, %v963_v16  ;;  %v1112_v8 = vpop.f32.mrb[45].mxu1 }
 0x280   :  { %v1113_v20 = vadd.f32 %v1112_v8, %v963_v16  ;;  %v1114_v23 = vpop.f32.mrb[46].mxu1  ;;  %1186 = vmatprep.subr.bf16.mxu1 %v1154_v17 }
 0x281   :  { %v1115_v24 = vadd.f32 %v1114_v23, %v968_v21  ;;  %v1116_v22 = vpop.f32.mrb[47].mxu1  ;;  %1187 = vmatpush1.bf16.msra.mxu1 %v1153_v15  ;;  %v1139_v28 = vmax.f32 %v1111_v19, 0.0 }
 0x282   :  { %v1117_v25 = vadd.f32 %v1116_v22, %v968_v21  ;;  %v1140_v27 = vmax.f32 %v1113_v20, 0.0 }
 0x283   :  { %v1141_v26 = vmax.f32 %v1115_v24, 0.0 }
 0x284   :  { %v1142_v30 = vmax.f32 %v1117_v25, 0.0 }
 0x285   :  { %v1155_v31 = vpack.c.bf16 %v1141_v26, %v1139_v28 }
 0x286   :  { %v1156_v61 = vpack.c.bf16 %v1142_v30, %v1140_v27 }
 0x288   :  { %1188 = vmatprep.subr.bf16.mxu1 %v1156_v61 }
 0x289   :  { %1189 = vmatpush1.bf16.msra.mxu1 %v1155_v31 }
 0x28c   :  { %1333 = vmatmul.mubr.msk.bf16.vlgmr.msra.gmra.mrb[48].mxu1 %vm1174_vm3, %v1542_v34 }
 0x35f   :  { %v1212_v62 = vpop.f32.mrb[48].mxu1 }
 0x360   :  { %v1213_v63 = vadd.f32 %v1212_v62, %v1162_v35  ;;  %v1214_v37 = vpop.f32.mrb[49].mxu1 }
 0x361   :  { %v1215_v0 = vadd.f32 %v1214_v37, %v1162_v35  ;;  %v1216_v38 = vpop.f32.mrb[50].mxu1 }
 0x362   :  { %1221 = vst [vmem:[%s2125_s7] sm:$0xff] %v1213_v63  ;;  %v1217_v46 = vadd.f32 %v1216_v38, %v1167_v44  ;;  %v1218_v39 = vpop.f32.mrb[51].mxu1 }
 0x363   :  { %1222 = vst [vmem:[%s2125_s7 + $0x8] sm:$0xff] %v1215_v0  ;;  %v1219_v40 = vadd.f32 %v1218_v39, %v1167_v44 }
 0x364   :  { %1223 = vst [vmem:[%s2125_s7 + $0x10] sm:$0xff] %v1217_v46 }
 0x365   :  { %1224 = vst [vmem:[%s2125_s7 + $0x18] sm:$0xff] %v1219_v40 }

</bundles_post_ra>
